<compile_context>
chip_gen: v6e
topology: v6e:2x2x1
jax: 0.10.0
libtpu: 0.0.40
codegen_flags: <defaults>
</compile_context>

<pallas_src>
import jax
import jax.numpy as jnp
from jax.experimental import pallas as pl
from jax.experimental.pallas import tpu as pltpu


def _feature_processor_kernel(
    pw_full_ref, pw_tile_ref, rel_ref, mask_ref,
    rw0a_ref, rw0b_ref, rw0c_ref, rb0_ref, rw1_ref, rb1_ref, rw2_ref, rb2_ref,
    qw0a_ref, qw0b_ref, qb0_ref, qw1_ref, qb1_ref, qw2_ref, qb2_ref,
    rel_out_ref, pw_out_ref):
  """One (batch, i-tile) grid step: TI query rows against all N j-columns."""
  pw_all = pw_full_ref[0]        # (N, P)   pointwise features of every point j
  pw_i = pw_tile_ref[0]          # (TI, P)  pointwise features of this i-tile
  rel = rel_ref[0]               # (TI, N, R)
  mask_j = mask_ref[0]           # (1, N)   1.0 = real point, 0.0 = padded

  ti, n, r = rel.shape

  # ---- relative-features MLP, layer 0 (first-layer weight split over the
  # concat [pw_i | pw_j | rel], so the concat is never materialized; the
  # layer-0 bias is folded into the per-j term) ----
  a = jnp.dot(pw_i, rw0a_ref[...], preferred_element_type=jnp.float32)    # (TI, H1)
  c = jnp.dot(pw_all, rw0b_ref[...],
              preferred_element_type=jnp.float32) + rb0_ref[...]          # (N, H1)
  h = jnp.dot(rel.reshape(ti * n, r), rw0c_ref[...],
              preferred_element_type=jnp.float32)                         # (TI*N, H1)
  # TI and N are multiples of 8, so these 2D<->3D reshapes only regroup the
  # leading (sublane) dims: layout-preserving, no relayout copies.
  h = h.reshape(ti, n, -1) + a[:, None, :] + c[None, :, :]
  h = jnp.maximum(h, 0.0)

  # ---- hidden layer ----
  h = jnp.dot(h.reshape(ti * n, -1), rw1_ref[...],
              preferred_element_type=jnp.float32) + rb1_ref[...]
  h2 = jnp.maximum(h, 0.0)                                                # (TI*N, H2)

  # ---- apply the j-mask once at H2 width; reused for both the relative
  # output and the masked mean ----
  h2m = h2.reshape(ti, n, -1) * mask_j[:, :, None]                        # (TI, N, H2)

  # ---- masked mean over j, computed algebraically from h2m (output layer is
  # linear):  mean_j m_j*(h2@W2+b2) == ((sum_j m_j*h2)/num) @ W2 + b2 ----
  num = jnp.sum(mask_j, axis=-1, keepdims=True)                           # (1, 1)
  s = jnp.sum(h2m, axis=1) / num                                          # (TI, H2)
  avg = jnp.dot(s, rw2_ref[...], preferred_element_type=jnp.float32) + rb2_ref[...]

  # ---- output layer of the relative MLP with the mask already folded in:
  # (m_j*h2) @ W2 + m_j*b2  (bias masking is only O(N*R_out)) ----
  rel_o = jnp.dot(h2m.reshape(ti * n, -1), rw2_ref[...],
                  preferred_element_type=jnp.float32)
  mb2 = mask_j[:, :, None] * rb2_ref[...][None, :, :]                     # (1, N, R_out)
  rel_o = rel_o.reshape(ti, n, -1) + mb2
  rel_out_ref[0] = rel_o.astype(rel_out_ref.dtype)

  # ---- pointwise MLP on [pw_i | avg] (first-layer weight split again) ----
  g = (jnp.dot(pw_i, qw0a_ref[...], preferred_element_type=jnp.float32)
       + jnp.dot(avg, qw0b_ref[...], preferred_element_type=jnp.float32)
       + qb0_ref[...])
  g = jnp.maximum(g, 0.0)
  g = jnp.dot(g, qw1_ref[...], preferred_element_type=jnp.float32) + qb1_ref[...]
  g = jnp.maximum(g, 0.0)
  out = jnp.dot(g, qw2_ref[...], preferred_element_type=jnp.float32) + qb2_ref[...]
  pw_out_ref[0] = out.astype(pw_out_ref.dtype)


def _pick_tile_i(n, r, r_out, h1, h2, budget_bytes):
  """Largest multiple-of-8 divisor of n whose per-step VMEM footprint fits."""
  def lanes(x):
    return ((x + 127) // 128) * 128
  # Double-buffered rel in/out blocks + the two pair-sized intermediates,
  # all lane-padded f32 (the small feature dims pad to 128 lanes).
  per_row = 4 * n * (2 * lanes(r) + 2 * lanes(r_out) + lanes(h1) + lanes(h2))
  cap = max(8, budget_bytes // max(per_row, 1))
  best = None
  t = 8
  while t <= min(n, cap):
    if n % t == 0:
      best = t
    t += 8
  return best if best is not None else n


def feature_processor(relative_features, pointwise_features, adj_list,
                      masked_elements, params, *, tile_i=None):
  """Pallas implementation of FeatureProcessor.forward.

  Returns (processed_relative_features, processed_pointwise_features).
  Preconditions (same as the PyTorch reference): every batch element has at
  least one unmasked point (otherwise the masked mean is NaN).  Masked rows i
  still receive outputs, exactly like the reference; downstream code masks
  them.
  """
  del adj_list  # not used by the forward pass (kept for signature parity)
  B, N, P = pointwise_features.shape
  R = relative_features.shape[-1]

  rel_w, rel_b = params["rel_w"], params["rel_b"]
  pw_w, pw_b = params["pw_w"], params["pw_b"]
  assert len(rel_w) == 3 and len(pw_w) == 3, "kernel is specialized to 2 hidden layers"
  H1, H2 = rel_w[0].shape[-1], rel_w[1].shape[-1]
  R_out = rel_w[-1].shape[-1]
  P_out = pw_w[-1].shape[-1]

  # Split the first-layer weights along the concatenation axis.
  rw0 = rel_w[0]                               # (2P + R, H1)
  rw0a, rw0b, rw0c = rw0[:P], rw0[P:2 * P], rw0[2 * P:]
  qw0 = pw_w[0]                                # (P + R_out, H1)
  qw0a, qw0b = qw0[:P], qw0[P:]

  # Per-generation VMEM budgeting (v5e 16 MiB scoped default / 128 MiB phys,
  # v6e 32/128, v7x 32/64): size the i-tile from physical VMEM and raise the
  # scoped limit explicitly.
  try:
    phys_vmem = int(pltpu.get_tpu_info().vmem_capacity_bytes)
  except Exception:
    phys_vmem = 64 * 1024 * 1024   # conservative fallback (v7x physical)
  vmem_limit = int(min(max(phys_vmem * 3 // 4, 32 * 1024 * 1024),
                       96 * 1024 * 1024))
  if tile_i is None:
    tile_i = _pick_tile_i(N, R, R_out, H1, H2, phys_vmem // 4)
  assert N % tile_i == 0, "tile_i must divide the number of points"

  f32 = jnp.float32
  unm = (~masked_elements).astype(f32)                 # (B, N), 1 = keep
  mask_j = unm.reshape(B, 1, N)

  def wspec(shape):
    # Constant block index across both grid axes: weights stay VMEM-resident.
    return pl.BlockSpec(shape, lambda b, i, s=shape: (0,) * len(s))

  in_specs = [
      pl.BlockSpec((1, N, P), lambda b, i: (b, 0, 0)),            # all points (j side)
      pl.BlockSpec((1, tile_i, P), lambda b, i: (b, i, 0)),       # i-tile points
      pl.BlockSpec((1, tile_i, N, R), lambda b, i: (b, i, 0, 0)),
      pl.BlockSpec((1, 1, N), lambda b, i: (b, 0, 0)),            # mask_j
      wspec(rw0a.shape), wspec(rw0b.shape), wspec(rw0c.shape), wspec(rel_b[0].shape),
      wspec(rel_w[1].shape), wspec(rel_b[1].shape),
      wspec(rel_w[2].shape), wspec(rel_b[2].shape),
      wspec(qw0a.shape), wspec(qw0b.shape), wspec(pw_b[0].shape),
      wspec(pw_w[1].shape), wspec(pw_b[1].shape),
      wspec(pw_w[2].shape), wspec(pw_b[2].shape),
  ]
  out_specs = [
      pl.BlockSpec((1, tile_i, N, R_out), lambda b, i: (b, i, 0, 0)),
      pl.BlockSpec((1, tile_i, P_out), lambda b, i: (b, i, 0)),
  ]

  rel_out, pw_out = pl.pallas_call(
      _feature_processor_kernel,
      out_shape=(jax.ShapeDtypeStruct((B, N, N, R_out), f32),
                 jax.ShapeDtypeStruct((B, N, P_out), f32)),
      grid_spec=pltpu.PrefetchScalarGridSpec(
          num_scalar_prefetch=0,
          grid=(B, N // tile_i),
          in_specs=in_specs,
          out_specs=out_specs),
      compiler_params=pltpu.CompilerParams(
          dimension_semantics=("parallel", "parallel"),
          vmem_limit_bytes=vmem_limit),
  )(pointwise_features, pointwise_features, relative_features, mask_j,
    rw0a, rw0b, rw0c, rel_b[0], rel_w[1], rel_b[1], rel_w[2], rel_b[2],
    qw0a, qw0b, pw_b[0], pw_w[1], pw_b[1], pw_w[2], pw_b[2])
  return rel_out, pw_out


# ---------------- pure-JAX reference (mirrors the PyTorch forward) ------------

def _mlp_ref(ws, bs, x):
  for w, b in zip(ws[:-1], bs[:-1]):
    x = jnp.maximum(jnp.dot(x, w) + b, 0.0)
  return jnp.dot(x, ws[-1]) + bs[-1]


def reference(relative_features, pointwise_features, masked_elements, params):
  B, N, P = pointwise_features.shape
  pw_i = jnp.broadcast_to(pointwise_features[:, :, None, :], (B, N, N, P))
  pw_j = jnp.broadcast_to(pointwise_features[:, None, :, :], (B, N, N, P))
  x = jnp.concatenate([pw_i, pw_j, relative_features], axis=-1)
  rel = _mlp_ref(params["rel_w"], params["rel_b"], x)
  unm = (~masked_elements)[:, None, :, None].astype(rel.dtype)
  rel = rel * unm
  num_atoms = (~masked_elements).sum(axis=-1).astype(rel.dtype)
  avg = rel.sum(-2) / num_atoms[:, None, None]
  pw = _mlp_ref(params["pw_w"], params["pw_b"],
                jnp.concatenate([pointwise_features, avg], axis=-1))
  return rel, pw


def init_mlp(key, dims):
  ws, bs = [], []
  for din, dout in zip(dims[:-1], dims[1:]):
    key, kw, kb = jax.random.split(key, 3)
    ws.append(jax.random.normal(kw, (din, dout), jnp.float32) / jnp.sqrt(din))
    bs.append(jax.random.normal(kb, (1, dout), jnp.float32) * 0.1)
  return ws, bs


if __name__ == "__main__":
  key = jax.random.PRNGKey(0)
  B, N = 2, 16                # N a multiple of 8 (layout-preserving reshapes)
  P_in, R_in = 8, 16          # input pointwise / raw relative feature dims
  P_out, R_out = 8, 16        # processed pointwise / relative feature dims
  hidden = (32, 32)           # hidden_layers_dims

  k1, k2, k3, k4 = jax.random.split(key, 4)
  pointwise = jax.random.normal(k1, (B, N, P_in), jnp.float32)
  relative = jax.random.normal(k2, (B, N, N, R_in), jnp.float32)
  # Different number of padded points per batch element.
  masked = jnp.arange(N)[None, :] >= jnp.array([[N - 2], [N - 5]])
  adj_list = jnp.zeros((B, N, N), dtype=jnp.int32)   # unused by the forward

  rel_dims = (2 * P_in + R_in,) + hidden + (R_out,)
  pw_dims = (P_in + R_out,) + hidden + (P_out,)
  rel_w, rel_b = init_mlp(k3, rel_dims)
  pw_w, pw_b = init_mlp(k4, pw_dims)
  params = {"rel_w": rel_w, "rel_b": rel_b, "pw_w": pw_w, "pw_b": pw_b}

  # tile_i=8 -> grid (B=2, N//TI=2): exercises the i-tiled pipeline.
  rel_out, pw_out = feature_processor(relative, pointwise, adj_list, masked,
                                      params, tile_i=8)
  jax.block_until_ready((rel_out, pw_out))

  ref_rel, ref_pw = reference(relative, pointwise, masked, params)
  assert rel_out.shape == (B, N, N, R_out) and pw_out.shape == (B, N, P_out)
  assert jnp.allclose(rel_out, ref_rel, atol=1e-4, rtol=1e-4)
  assert jnp.allclose(pw_out, ref_pw, atol=1e-4, rtol=1e-4)
  print("KERNEL_OK")
</pallas_src>

<mosaic_0001>
module attributes {stable_mosaic.version = 11 : i64} {
  func.func @_feature_processor_kernel(%arg0: i32, %arg1: i32, %arg2: memref<1x16x8xf32, #tpu.memory_space<vmem>>, %arg3: memref<1x8x8xf32, #tpu.memory_space<vmem>>, %arg4: memref<1x8x16x16xf32, #tpu.memory_space<vmem>>, %arg5: memref<1x1x16xf32, #tpu.memory_space<vmem>>, %arg6: memref<8x32xf32, #tpu.memory_space<vmem>>, %arg7: memref<8x32xf32, #tpu.memory_space<vmem>>, %arg8: memref<16x32xf32, #tpu.memory_space<vmem>>, %arg9: memref<1x32xf32, #tpu.memory_space<vmem>>, %arg10: memref<32x32xf32, #tpu.memory_space<vmem>>, %arg11: memref<1x32xf32, #tpu.memory_space<vmem>>, %arg12: memref<32x16xf32, #tpu.memory_space<vmem>>, %arg13: memref<1x16xf32, #tpu.memory_space<vmem>>, %arg14: memref<8x32xf32, #tpu.memory_space<vmem>>, %arg15: memref<16x32xf32, #tpu.memory_space<vmem>>, %arg16: memref<1x32xf32, #tpu.memory_space<vmem>>, %arg17: memref<32x32xf32, #tpu.memory_space<vmem>>, %arg18: memref<1x32xf32, #tpu.memory_space<vmem>>, %arg19: memref<32x8xf32, #tpu.memory_space<vmem>>, %arg20: memref<1x8xf32, #tpu.memory_space<vmem>>, %arg21: memref<1x8x16x16xf32, #tpu.memory_space<vmem>>, %arg22: memref<1x8x8xf32, #tpu.memory_space<vmem>>) attributes {dimension_semantics = [#tpu.dimension_semantics<parallel>, #tpu.dimension_semantics<parallel>], iteration_bounds = array<i64: 2, 2>, scalar_prefetch = 0 : i64, scratch_operands = 0 : i64, tpu.core_type = #tpu.core_type<tc>, window_params = [{transform_indices = @transform_0, window_bounds = array<i64: 1, 16, 8>}, {transform_indices = @transform_1, window_bounds = array<i64: 1, 8, 8>}, {transform_indices = @transform_2, window_bounds = array<i64: 1, 8, 16, 16>}, {transform_indices = @transform_3, window_bounds = array<i64: 1, 1, 16>}, {pipeline_mode = #tpu.pipeline_mode<synchronous>, transform_indices = @transform_4, window_bounds = array<i64: 8, 32>}, {pipeline_mode = #tpu.pipeline_mode<synchronous>, transform_indices = @transform_5, window_bounds = array<i64: 8, 32>}, {pipeline_mode = #tpu.pipeline_mode<synchronous>, transform_indices = @transform_6, window_bounds = array<i64: 16, 32>}, {pipeline_mode = #tpu.pipeline_mode<synchronous>, transform_indices = @transform_7, window_bounds = array<i64: 1, 32>}, {pipeline_mode = #tpu.pipeline_mode<synchronous>, transform_indices = @transform_8, window_bounds = array<i64: 32, 32>}, {pipeline_mode = #tpu.pipeline_mode<synchronous>, transform_indices = @transform_9, window_bounds = array<i64: 1, 32>}, {pipeline_mode = #tpu.pipeline_mode<synchronous>, transform_indices = @transform_10, window_bounds = array<i64: 32, 16>}, {pipeline_mode = #tpu.pipeline_mode<synchronous>, transform_indices = @transform_11, window_bounds = array<i64: 1, 16>}, {pipeline_mode = #tpu.pipeline_mode<synchronous>, transform_indices = @transform_12, window_bounds = array<i64: 8, 32>}, {pipeline_mode = #tpu.pipeline_mode<synchronous>, transform_indices = @transform_13, window_bounds = array<i64: 16, 32>}, {pipeline_mode = #tpu.pipeline_mode<synchronous>, transform_indices = @transform_14, window_bounds = array<i64: 1, 32>}, {pipeline_mode = #tpu.pipeline_mode<synchronous>, transform_indices = @transform_15, window_bounds = array<i64: 32, 32>}, {pipeline_mode = #tpu.pipeline_mode<synchronous>, transform_indices = @transform_16, window_bounds = array<i64: 1, 32>}, {pipeline_mode = #tpu.pipeline_mode<synchronous>, transform_indices = @transform_17, window_bounds = array<i64: 32, 8>}, {pipeline_mode = #tpu.pipeline_mode<synchronous>, transform_indices = @transform_18, window_bounds = array<i64: 1, 8>}, {transform_indices = @transform_19, window_bounds = array<i64: 1, 8, 16, 16>}, {transform_indices = @transform_20, window_bounds = array<i64: 1, 8, 8>}]} {
    %c0 = arith.constant 0 : index
    %c0_0 = arith.constant 0 : index
    %c0_1 = arith.constant 0 : index
    %0 = vector.load %arg2[%c0, %c0_0, %c0_1] : memref<1x16x8xf32, #tpu.memory_space<vmem>>, vector<1x16x8xf32>
    %1 = vector.shape_cast %0 : vector<1x16x8xf32> to vector<16x8xf32>
    %c0_2 = arith.constant 0 : index
    %c0_3 = arith.constant 0 : index
    %c0_4 = arith.constant 0 : index
    %2 = vector.load %arg3[%c0_2, %c0_3, %c0_4] : memref<1x8x8xf32, #tpu.memory_space<vmem>>, vector<1x8x8xf32>
    %3 = vector.shape_cast %2 : vector<1x8x8xf32> to vector<8x8xf32>
    %c0_5 = arith.constant 0 : index
    %c0_6 = arith.constant 0 : index
    %c0_7 = arith.constant 0 : index
    %c0_8 = arith.constant 0 : index
    %4 = vector.load %arg4[%c0_5, %c0_6, %c0_7, %c0_8] : memref<1x8x16x16xf32, #tpu.memory_space<vmem>>, vector<1x8x16x16xf32>
    %5 = vector.shape_cast %4 : vector<1x8x16x16xf32> to vector<8x16x16xf32>
    %c0_9 = arith.constant 0 : index
    %c0_10 = arith.constant 0 : index
    %c0_11 = arith.constant 0 : index
    %6 = vector.load %arg5[%c0_9, %c0_10, %c0_11] : memref<1x1x16xf32, #tpu.memory_space<vmem>>, vector<1x1x16xf32>
    %7 = vector.shape_cast %6 : vector<1x1x16xf32> to vector<1x16xf32>
    %c0_12 = arith.constant 0 : index
    %c0_13 = arith.constant 0 : index
    %8 = vector.load %arg6[%c0_12, %c0_13] : memref<8x32xf32, #tpu.memory_space<vmem>>, vector<8x32xf32>
    %cst = arith.constant dense<0.000000e+00> : vector<8x32xf32>
    %9 = tpu.matmul %3, %8, %cst {dimension_numbers = #tpu.dot_dimension_numbers<[1], [0], [0], [1], [0, 0, 1, 1], [], []>} : vector<8x8xf32>, vector<8x32xf32>, vector<8x32xf32> -> vector<8x32xf32>
    %c0_14 = arith.constant 0 : index
    %c0_15 = arith.constant 0 : index
    %10 = vector.load %arg7[%c0_14, %c0_15] : memref<8x32xf32, #tpu.memory_space<vmem>>, vector<8x32xf32>
    %cst_16 = arith.constant dense<0.000000e+00> : vector<16x32xf32>
    %11 = tpu.matmul %1, %10, %cst_16 {dimension_numbers = #tpu.dot_dimension_numbers<[1], [0], [0], [1], [0, 0, 1, 1], [], []>} : vector<16x8xf32>, vector<8x32xf32>, vector<16x32xf32> -> vector<16x32xf32>
    %c0_17 = arith.constant 0 : index
    %c0_18 = arith.constant 0 : index
    %12 = vector.load %arg9[%c0_17, %c0_18] : memref<1x32xf32, #tpu.memory_space<vmem>>, vector<1x32xf32>
    %13 = vector.broadcast %12 : vector<1x32xf32> to vector<16x32xf32>
    %14 = arith.addf %11, %13 : vector<16x32xf32>
    %15 = vector.shape_cast %5 : vector<8x16x16xf32> to vector<128x16xf32>
    %c0_19 = arith.constant 0 : index
    %c0_20 = arith.constant 0 : index
    %16 = vector.load %arg8[%c0_19, %c0_20] : memref<16x32xf32, #tpu.memory_space<vmem>>, vector<16x32xf32>
    %cst_21 = arith.constant dense<0.000000e+00> : vector<128x32xf32>
    %17 = tpu.matmul %15, %16, %cst_21 {dimension_numbers = #tpu.dot_dimension_numbers<[1], [0], [0], [1], [0, 0, 1, 1], [], []>} : vector<128x16xf32>, vector<16x32xf32>, vector<128x32xf32> -> vector<128x32xf32>
    %18 = vector.shape_cast %17 : vector<128x32xf32> to vector<8x16x32xf32>
    %19 = vector.shape_cast %9 : vector<8x32xf32> to vector<8x1x32xf32>
    %20 = vector.broadcast %19 : vector<8x1x32xf32> to vector<8x16x32xf32>
    %21 = arith.addf %18, %20 : vector<8x16x32xf32>
    %22 = vector.shape_cast %14 : vector<16x32xf32> to vector<1x16x32xf32>
    %23 = vector.broadcast %22 : vector<1x16x32xf32> to vector<8x16x32xf32>
    %24 = arith.addf %21, %23 : vector<8x16x32xf32>
    %cst_22 = arith.constant 0.000000e+00 : f32
    %25 = vector.broadcast %cst_22 : f32 to vector<8x16x32xf32>
    %26 = arith.maximumf %24, %25 : vector<8x16x32xf32>
    %27 = vector.shape_cast %26 : vector<8x16x32xf32> to vector<128x32xf32>
    %c0_23 = arith.constant 0 : index
    %c0_24 = arith.constant 0 : index
    %28 = vector.load %arg10[%c0_23, %c0_24] : memref<32x32xf32, #tpu.memory_space<vmem>>, vector<32x32xf32>
    %cst_25 = arith.constant dense<0.000000e+00> : vector<128x32xf32>
    %29 = tpu.matmul %27, %28, %cst_25 {dimension_numbers = #tpu.dot_dimension_numbers<[1], [0], [0], [1], [0, 0, 1, 1], [], []>} : vector<128x32xf32>, vector<32x32xf32>, vector<128x32xf32> -> vector<128x32xf32>
    %c0_26 = arith.constant 0 : index
    %c0_27 = arith.constant 0 : index
    %30 = vector.load %arg11[%c0_26, %c0_27] : memref<1x32xf32, #tpu.memory_space<vmem>>, vector<1x32xf32>
    %31 = vector.broadcast %30 : vector<1x32xf32> to vector<128x32xf32>
    %32 = arith.addf %29, %31 : vector<128x32xf32>
    %cst_28 = arith.constant 0.000000e+00 : f32
    %33 = vector.broadcast %cst_28 : f32 to vector<128x32xf32>
    %34 = arith.maximumf %32, %33 : vector<128x32xf32>
    %35 = vector.shape_cast %34 : vector<128x32xf32> to vector<8x16x32xf32>
    %36 = vector.shape_cast %7 : vector<1x16xf32> to vector<1x16x1xf32>
    %37 = vector.broadcast %36 : vector<1x16x1xf32> to vector<8x16x32xf32>
    %38 = arith.mulf %35, %37 : vector<8x16x32xf32>
    %cst_29 = arith.constant dense<0.000000e+00> : vector<1xf32>
    %39 = vector.multi_reduction <add>, %7, %cst_29 [1] : vector<1x16xf32> to vector<1xf32>
    %40 = vector.shape_cast %39 : vector<1xf32> to vector<1x1xf32>
    %cst_30 = arith.constant dense<0.000000e+00> : vector<8x32xf32>
    %41 = vector.multi_reduction <add>, %38, %cst_30 [1] : vector<8x16x32xf32> to vector<8x32xf32>
    %42 = vector.broadcast %40 : vector<1x1xf32> to vector<8x32xf32>
    %43 = arith.divf %41, %42 : vector<8x32xf32>
    %c0_31 = arith.constant 0 : index
    %c0_32 = arith.constant 0 : index
    %44 = vector.load %arg12[%c0_31, %c0_32] : memref<32x16xf32, #tpu.memory_space<vmem>>, vector<32x16xf32>
    %cst_33 = arith.constant dense<0.000000e+00> : vector<8x16xf32>
    %45 = tpu.matmul %43, %44, %cst_33 {dimension_numbers = #tpu.dot_dimension_numbers<[1], [0], [0], [1], [0, 0, 1, 1], [], []>} : vector<8x32xf32>, vector<32x16xf32>, vector<8x16xf32> -> vector<8x16xf32>
    %c0_34 = arith.constant 0 : index
    %c0_35 = arith.constant 0 : index
    %46 = vector.load %arg13[%c0_34, %c0_35] : memref<1x16xf32, #tpu.memory_space<vmem>>, vector<1x16xf32>
    %47 = vector.broadcast %46 : vector<1x16xf32> to vector<8x16xf32>
    %48 = arith.addf %45, %47 : vector<8x16xf32>
    %49 = vector.shape_cast %38 : vector<8x16x32xf32> to vector<128x32xf32>
    %c0_36 = arith.constant 0 : index
    %c0_37 = arith.constant 0 : index
    %50 = vector.load %arg12[%c0_36, %c0_37] : memref<32x16xf32, #tpu.memory_space<vmem>>, vector<32x16xf32>
    %cst_38 = arith.constant dense<0.000000e+00> : vector<128x16xf32>
    %51 = tpu.matmul %49, %50, %cst_38 {dimension_numbers = #tpu.dot_dimension_numbers<[1], [0], [0], [1], [0, 0, 1, 1], [], []>} : vector<128x32xf32>, vector<32x16xf32>, vector<128x16xf32> -> vector<128x16xf32>
    %52 = vector.shape_cast %7 : vector<1x16xf32> to vector<1x16x1xf32>
    %c0_39 = arith.constant 0 : index
    %c0_40 = arith.constant 0 : index
    %53 = vector.load %arg13[%c0_39, %c0_40] : memref<1x16xf32, #tpu.memory_space<vmem>>, vector<1x16xf32>
    %54 = vector.shape_cast %53 : vector<1x16xf32> to vector<1x1x16xf32>
    %55 = vector.broadcast %52 : vector<1x16x1xf32> to vector<1x16x16xf32>
    %56 = vector.broadcast %54 : vector<1x1x16xf32> to vector<1x16x16xf32>
    %57 = arith.mulf %55, %56 : vector<1x16x16xf32>
    %58 = vector.shape_cast %51 : vector<128x16xf32> to vector<8x16x16xf32>
    %59 = vector.broadcast %57 : vector<1x16x16xf32> to vector<8x16x16xf32>
    %60 = arith.addf %58, %59 : vector<8x16x16xf32>
    %c0_41 = arith.constant 0 : index
    %c0_42 = arith.constant 0 : index
    %c0_43 = arith.constant 0 : index
    %c0_44 = arith.constant 0 : index
    %61 = vector.load %arg21[%c0_41, %c0_42, %c0_43, %c0_44] : memref<1x8x16x16xf32, #tpu.memory_space<vmem>>, vector<1x8x16x16xf32>
    %62 = vector.shape_cast %61 : vector<1x8x16x16xf32> to vector<8x16x16xf32>
    %63 = vector.shape_cast %60 : vector<8x16x16xf32> to vector<1x8x16x16xf32>
    tpu.vector_store %arg21[%c0_41, %c0_42, %c0_43, %c0_44], %63 {strides = array<i32>} : memref<1x8x16x16xf32, #tpu.memory_space<vmem>>, vector<1x8x16x16xf32>,
    %c0_45 = arith.constant 0 : index
    %c0_46 = arith.constant 0 : index
    %64 = vector.load %arg14[%c0_45, %c0_46] : memref<8x32xf32, #tpu.memory_space<vmem>>, vector<8x32xf32>
    %cst_47 = arith.constant dense<0.000000e+00> : vector<8x32xf32>
    %65 = tpu.matmul %3, %64, %cst_47 {dimension_numbers = #tpu.dot_dimension_numbers<[1], [0], [0], [1], [0, 0, 1, 1], [], []>} : vector<8x8xf32>, vector<8x32xf32>, vector<8x32xf32> -> vector<8x32xf32>
    %c0_48 = arith.constant 0 : index
    %c0_49 = arith.constant 0 : index
    %66 = vector.load %arg15[%c0_48, %c0_49] : memref<16x32xf32, #tpu.memory_space<vmem>>, vector<16x32xf32>
    %cst_50 = arith.constant dense<0.000000e+00> : vector<8x32xf32>
    %67 = tpu.matmul %48, %66, %cst_50 {dimension_numbers = #tpu.dot_dimension_numbers<[1], [0], [0], [1], [0, 0, 1, 1], [], []>} : vector<8x16xf32>, vector<16x32xf32>, vector<8x32xf32> -> vector<8x32xf32>
    %68 = arith.addf %65, %67 : vector<8x32xf32>
    %c0_51 = arith.constant 0 : index
    %c0_52 = arith.constant 0 : index
    %69 = vector.load %arg16[%c0_51, %c0_52] : memref<1x32xf32, #tpu.memory_space<vmem>>, vector<1x32xf32>
    %70 = vector.broadcast %69 : vector<1x32xf32> to vector<8x32xf32>
    %71 = arith.addf %68, %70 : vector<8x32xf32>
    %cst_53 = arith.constant 0.000000e+00 : f32
    %72 = vector.broadcast %cst_53 : f32 to vector<8x32xf32>
    %73 = arith.maximumf %71, %72 : vector<8x32xf32>
    %c0_54 = arith.constant 0 : index
    %c0_55 = arith.constant 0 : index
    %74 = vector.load %arg17[%c0_54, %c0_55] : memref<32x32xf32, #tpu.memory_space<vmem>>, vector<32x32xf32>
    %cst_56 = arith.constant dense<0.000000e+00> : vector<8x32xf32>
    %75 = tpu.matmul %73, %74, %cst_56 {dimension_numbers = #tpu.dot_dimension_numbers<[1], [0], [0], [1], [0, 0, 1, 1], [], []>} : vector<8x32xf32>, vector<32x32xf32>, vector<8x32xf32> -> vector<8x32xf32>
    %c0_57 = arith.constant 0 : index
    %c0_58 = arith.constant 0 : index
    %76 = vector.load %arg18[%c0_57, %c0_58] : memref<1x32xf32, #tpu.memory_space<vmem>>, vector<1x32xf32>
    %77 = vector.broadcast %76 : vector<1x32xf32> to vector<8x32xf32>
    %78 = arith.addf %75, %77 : vector<8x32xf32>
    %cst_59 = arith.constant 0.000000e+00 : f32
    %79 = vector.broadcast %cst_59 : f32 to vector<8x32xf32>
    %80 = arith.maximumf %78, %79 : vector<8x32xf32>
    %c0_60 = arith.constant 0 : index
    %c0_61 = arith.constant 0 : index
    %81 = vector.load %arg19[%c0_60, %c0_61] : memref<32x8xf32, #tpu.memory_space<vmem>>, vector<32x8xf32>
    %cst_62 = arith.constant dense<0.000000e+00> : vector<8x8xf32>
    %82 = tpu.matmul %80, %81, %cst_62 {dimension_numbers = #tpu.dot_dimension_numbers<[1], [0], [0], [1], [0, 0, 1, 1], [], []>} : vector<8x32xf32>, vector<32x8xf32>, vector<8x8xf32> -> vector<8x8xf32>
    %c0_63 = arith.constant 0 : index
    %c0_64 = arith.constant 0 : index
    %83 = vector.load %arg20[%c0_63, %c0_64] : memref<1x8xf32, #tpu.memory_space<vmem>>, vector<1x8xf32>
    %84 = vector.broadcast %83 : vector<1x8xf32> to vector<8x8xf32>
    %85 = arith.addf %82, %84 : vector<8x8xf32>
    %c0_65 = arith.constant 0 : index
    %c0_66 = arith.constant 0 : index
    %c0_67 = arith.constant 0 : index
    %86 = vector.load %arg22[%c0_65, %c0_66, %c0_67] : memref<1x8x8xf32, #tpu.memory_space<vmem>>, vector<1x8x8xf32>
    %87 = vector.shape_cast %86 : vector<1x8x8xf32> to vector<8x8xf32>
    %88 = vector.shape_cast %85 : vector<8x8xf32> to vector<1x8x8xf32>
    tpu.vector_store %arg22[%c0_65, %c0_66, %c0_67], %88 {strides = array<i32>} : memref<1x8x8xf32, #tpu.memory_space<vmem>>, vector<1x8x8xf32>,
    return
  }
  func.func @transform_0(%arg0: i32, %arg1: i32) -> (i32, i32, i32) {
    %c0_i32 = arith.constant 0 : i32
    %c0_i32_0 = arith.constant 0 : i32
    %c0_i32_1 = arith.constant 0 : i32
    return %arg0, %c0_i32, %c0_i32_0 : i32, i32, i32
  }
  func.func @transform_1(%arg0: i32, %arg1: i32) -> (i32, i32, i32) {
    %c0_i32 = arith.constant 0 : i32
    %c0_i32_0 = arith.constant 0 : i32
    return %arg0, %arg1, %c0_i32 : i32, i32, i32
  }
  func.func @transform_2(%arg0: i32, %arg1: i32) -> (i32, i32, i32, i32) {
    %c0_i32 = arith.constant 0 : i32
    %c0_i32_0 = arith.constant 0 : i32
    %c0_i32_1 = arith.constant 0 : i32
    return %arg0, %arg1, %c0_i32, %c0_i32_0 : i32, i32, i32, i32
  }
  func.func @transform_3(%arg0: i32, %arg1: i32) -> (i32, i32, i32) {
    %c0_i32 = arith.constant 0 : i32
    %c0_i32_0 = arith.constant 0 : i32
    %c0_i32_1 = arith.constant 0 : i32
    return %arg0, %c0_i32, %c0_i32_0 : i32, i32, i32
  }
  func.func @transform_4(%arg0: i32, %arg1: i32) -> (i32, i32) {
    %c0_i32 = arith.constant 0 : i32
    %c0_i32_0 = arith.constant 0 : i32
    %c0_i32_1 = arith.constant 0 : i32
    return %c0_i32, %c0_i32_0 : i32, i32
  }
  func.func @transform_5(%arg0: i32, %arg1: i32) -> (i32, i32) {
    %c0_i32 = arith.constant 0 : i32
    %c0_i32_0 = arith.constant 0 : i32
    %c0_i32_1 = arith.constant 0 : i32
    return %c0_i32, %c0_i32_0 : i32, i32
  }
  func.func @transform_6(%arg0: i32, %arg1: i32) -> (i32, i32) {
    %c0_i32 = arith.constant 0 : i32
    %c0_i32_0 = arith.constant 0 : i32
    %c0_i32_1 = arith.constant 0 : i32
    return %c0_i32, %c0_i32_0 : i32, i32
  }
  func.func @transform_7(%arg0: i32, %arg1: i32) -> (i32, i32) {
    %c0_i32 = arith.constant 0 : i32
    %c0_i32_0 = arith.constant 0 : i32
    %c0_i32_1 = arith.constant 0 : i32
    return %c0_i32, %c0_i32_0 : i32, i32
  }
  func.func @transform_8(%arg0: i32, %arg1: i32) -> (i32, i32) {
    %c0_i32 = arith.constant 0 : i32
    %c0_i32_0 = arith.constant 0 : i32
    %c0_i32_1 = arith.constant 0 : i32
    return %c0_i32, %c0_i32_0 : i32, i32
  }
  func.func @transform_9(%arg0: i32, %arg1: i32) -> (i32, i32) {
    %c0_i32 = arith.constant 0 : i32
    %c0_i32_0 = arith.constant 0 : i32
    %c0_i32_1 = arith.constant 0 : i32
    return %c0_i32, %c0_i32_0 : i32, i32
  }
  func.func @transform_10(%arg0: i32, %arg1: i32) -> (i32, i32) {
    %c0_i32 = arith.constant 0 : i32
    %c0_i32_0 = arith.constant 0 : i32
    %c0_i32_1 = arith.constant 0 : i32
    return %c0_i32, %c0_i32_0 : i32, i32
  }
  func.func @transform_11(%arg0: i32, %arg1: i32) -> (i32, i32) {
    %c0_i32 = arith.constant 0 : i32
    %c0_i32_0 = arith.constant 0 : i32
    %c0_i32_1 = arith.constant 0 : i32
    return %c0_i32, %c0_i32_0 : i32, i32
  }
  func.func @transform_12(%arg0: i32, %arg1: i32) -> (i32, i32) {
    %c0_i32 = arith.constant 0 : i32
    %c0_i32_0 = arith.constant 0 : i32
    %c0_i32_1 = arith.constant 0 : i32
    return %c0_i32, %c0_i32_0 : i32, i32
  }
  func.func @transform_13(%arg0: i32, %arg1: i32) -> (i32, i32) {
    %c0_i32 = arith.constant 0 : i32
    %c0_i32_0 = arith.constant 0 : i32
    %c0_i32_1 = arith.constant 0 : i32
    return %c0_i32, %c0_i32_0 : i32, i32
  }
  func.func @transform_14(%arg0: i32, %arg1: i32) -> (i32, i32) {
    %c0_i32 = arith.constant 0 : i32
    %c0_i32_0 = arith.constant 0 : i32
    %c0_i32_1 = arith.constant 0 : i32
    return %c0_i32, %c0_i32_0 : i32, i32
  }
  func.func @transform_15(%arg0: i32, %arg1: i32) -> (i32, i32) {
    %c0_i32 = arith.constant 0 : i32
    %c0_i32_0 = arith.constant 0 : i32
    %c0_i32_1 = arith.constant 0 : i32
    return %c0_i32, %c0_i32_0 : i32, i32
  }
  func.func @transform_16(%arg0: i32, %arg1: i32) -> (i32, i32) {
    %c0_i32 = arith.constant 0 : i32
    %c0_i32_0 = arith.constant 0 : i32
    %c0_i32_1 = arith.constant 0 : i32
    return %c0_i32, %c0_i32_0 : i32, i32
  }
  func.func @transform_17(%arg0: i32, %arg1: i32) -> (i32, i32) {
    %c0_i32 = arith.constant 0 : i32
    %c0_i32_0 = arith.constant 0 : i32
    %c0_i32_1 = arith.constant 0 : i32
    return %c0_i32, %c0_i32_0 : i32, i32
  }
  func.func @transform_18(%arg0: i32, %arg1: i32) -> (i32, i32) {
    %c0_i32 = arith.constant 0 : i32
    %c0_i32_0 = arith.constant 0 : i32
    %c0_i32_1 = arith.constant 0 : i32
    return %c0_i32, %c0_i32_0 : i32, i32
  }
  func.func @transform_19(%arg0: i32, %arg1: i32) -> (i32, i32, i32, i32) {
    %c0_i32 = arith.constant 0 : i32
    %c0_i32_0 = arith.constant 0 : i32
    %c0_i32_1 = arith.constant 0 : i32
    return %arg0, %arg1, %c0_i32, %c0_i32_0 : i32, i32, i32, i32
  }
  func.func @transform_20(%arg0: i32, %arg1: i32) -> (i32, i32, i32) {
    %c0_i32 = arith.constant 0 : i32
    %c0_i32_0 = arith.constant 0 : i32
    return %arg0, %arg1, %c0_i32 : i32, i32, i32
  }
}

</mosaic_0001>

<bundles_post_ra>
// kernel: tpu_custom_call.1
= control target key start
LH: loop header
LB: loop body
LE: loop exit
PB: predicated region body
PF: predicated region fallthrough
CT: control target
= control target key end

     0   :  { %s3625_s0 = inlined_call_operand.vmem [shape: f32[2,16,8], index: 0, kind: input, shape index: {}]   ;;  %s3626_s1 = inlined_call_operand.vmem [shape: f32[2,16,8], index: 1, kind: input, shape index: {}]   ;;  %s3627_s2 = inlined_call_operand.hbm [shape: f32[2,16,16,16], index: 2, kind: input, shape index: {}]   ;;  %s3628_s3 = inlined_call_operand.vmem [shape: f32[2,1,16], index: 3, kind: input, shape index: {}]   ;;  %s3629_s4 = inlined_call_operand.vmem [shape: f32[8,32], index: 4, kind: input, shape index: {}]   ;;  %s3630_s5 = inlined_call_operand.vmem [shape: f32[8,32], index: 5, kind: input, shape index: {}]   ;;  %s3631_s6 = inlined_call_operand.vmem [shape: f32[16,32], index: 6, kind: input, shape index: {}]   ;;  %s3632_s7 = inlined_call_operand.vmem [shape: f32[1,32], index: 7, kind: input, shape index: {}]   ;;  %s3633_s8 = inlined_call_operand.vmem [shape: f32[32,32], index: 8, kind: input, shape index: {}]   ;;  %s3634_s9 = inlined_call_operand.vmem [shape: f32[1,32], index: 9, kind: input, shape index: {}]   ;;  %s3635_s10 = inlined_call_operand.vmem [shape: f32[32,16], index: 10, kind: input, shape index: {}]   ;;  %s3636_s11 = inlined_call_operand.vmem [shape: f32[1,16], index: 11, kind: input, shape index: {}]   ;;  %s3637_s12 = inlined_call_operand.vmem [shape: f32[8,32], index: 12, kind: input, shape index: {}]   ;;  %s3638_s13 = inlined_call_operand.vmem [shape: f32[16,32], index: 13, kind: input, shape index: {}]   ;;  %s3639_s14 = inlined_call_operand.vmem [shape: f32[1,32], index: 14, kind: input, shape index: {}]   ;;  %s3640_s15 = inlined_call_operand.vmem [shape: f32[32,32], index: 15, kind: input, shape index: {}]   ;;  %s3641_s16 = inlined_call_operand.vmem [shape: f32[1,32], index: 16, kind: input, shape index: {}]   ;;  %s3642_s17 = inlined_call_operand.vmem [shape: f32[32,8], index: 17, kind: input, shape index: {}]   ;;  %s3643_s18 = inlined_call_operand.vmem [shape: f32[1,8], index: 18, kind: input, shape index: {}]   ;;  %s3644_s19 = inlined_call_operand.hbm [shape: f32[2,16,16,16], index: 19, kind: output, shape index: {0}]   ;;  %s3645_s20 = inlined_call_operand.vmem [shape: f32[2,16,8], index: 20, kind: output, shape index: {1}]  }
   0x1   :  { %3657 = sst [smem:[#allocation15_spill]] %s3625_s0 }
   0x2   :  { %3658 = sst [smem:[#allocation16_spill]] %s3626_s1 }
   0x3   :  { %3659 = sst [smem:[#allocation17_spill]] %s3627_s2 }
   0x4   :  { %3660 = sst [smem:[#allocation18_spill]] %s3628_s3 }
   0x5   :  { %3661 = sst [smem:[#allocation19_spill]] %s3629_s4 }
   0x6   :  { %3662 = sst [smem:[#allocation20_spill]] %s3636_s11 }
   0x7   :  { %3663 = sst [smem:[#allocation21_spill]] %s3637_s12 }
   0x8   :  { %3664 = sst [smem:[#allocation22_spill]] %s3638_s13 }
   0x9   :  { %3665 = sst [smem:[#allocation23_spill]] %s3639_s14 }
   0xa   :  { %3666 = sst [smem:[#allocation24_spill]] %s3640_s15 }
   0xb   :  { %3667 = sst [smem:[#allocation25_spill]] %s3641_s16 }
   0xc   :  { %3668 = sst [smem:[#allocation26_spill]] %s3642_s17 }
   0xd   :  { %3669 = sst [smem:[#allocation27_spill]] %s3643_s18 }
   0xe   :  { %3670 = sst [smem:[#allocation28_spill]] %s3644_s19 }
   0xf   :  { %3671 = sst [smem:[#allocation29_spill]] %s3645_s20 }
  0x10   :  { %26 = vsyncpa [#allocation3], 0 }
  0x11   :  { %28 = vsyncpa [#allocation3 + $0x1], 0 }
  0x12   :  { %29 = vsyncpa [#allocation4], 0 }
  0x13   :  { %31 = vsyncpa [#allocation4 + $0x1], 0  ;;  %s3107_s1 = smov 0   ;;  %s3109_s22 = smov 0  }
  0x14   :  { %s3111_s23 = smov 0   ;;  %s3113_s24 = smov 0  }
  0x15   :  { %s3115_s2 = smov 0   ;;  %s3117_s25 = smov 0  }
  0x16   :  { %s3119_s3 = smov 0   ;;  %s3121_s26 = smov 0  }
  0x17 LB: > { %3672 = sst [smem:[#allocation8_spill]] %s2963_s1  ;;  %s2460_s27 = sadd.s32 4294967295, %s2991_s26   ;;  %s2991_s26 = sphi %s3121_s26, %s37_s26   ;;  %s2987_s3 = sphi %s3119_s3, %s3706_s3   ;;  %s2983_s25 = sphi %s3117_s25, %s3705_s25   ;;  %s2979_s2 = sphi %s3115_s2, %s3704_s2   ;;  %s2975_s24 = sphi %s3113_s24, %s3703_s24   ;;  %s2971_s23 = sphi %s3111_s23, %s3709_s23   ;;  %s2967_s22 = sphi %s3109_s22, %s3708_s22   ;;  %s2963_s1 = sphi %s3107_s1, %s3707_s1  }
  0x18   : > { %3673 = sst [smem:[#allocation9_spill]] %s2983_s25  ;;  %s2461_s28 = sadd.s32 4294967294, %s2991_s26  }
  0x19   : > { %3674 = sst [smem:[#allocation10_spill]] %s2987_s3  ;;  %s46_s4 = sadd.s32 1, %s2983_s25 }
  0x1a   : > { %s49_s29 = sadd.s32 1, %s2987_s3  ;;  %p47_p0 = scmp.ge.s32.totalorder %s46_s4, 2 }
  0x1b   : > { %s112_s30 = sadd.s32 1, %s2971_s23  ;;  %p119_p1 = scmp.ne.s32.totalorder %s2971_s23, %s2967_s22 }
  0x1c   : > { %p120_p2 = scmp.eq.s32.totalorder %s2991_s26, 0  ;;  %s3711_s4 = smov (%p47_p0, %s46_s4), 0 }
  0x1d   : > { %3675 = sst [smem:[#allocation11_spill]] %s3711_s4  ;;  %s3713_s29 = smov (!%p47_p0, %s49_s29), %s2987_s3 }
  0x1e   : > { %s108_s0 = ssub.s32 %s2983_s25, %s3711_s4  ;;  %p3160_p3 = por %p120_p2, %p119_p1 }
  0x1f   : > { %p51_p4 = scmp.ge.s32.totalorder %s3713_s29, 2  ;;  %p125_p5 = scmp.ne.s32.totalorder %s2967_s22, %s2963_s1 }
  0x20   : > { %p126_p6 = scmp.eq.s32.totalorder %s2460_s27, 0  ;;  %p492_p7 = scmp.eq.s32.totalorder %s2460_s27, 3 }
  0x21   : > { %s3715_s29 = smov (%p51_p4, %s3713_s29), 0  ;;  %p498_p10 = scmp.eq.s32.totalorder %s2461_s28, 3 }
  0x22   : > { %3677 = sst [smem:[#allocation12_spill]] %s3715_s29  ;;  %p3168_p8 = por %p126_p6, %p125_p5 }
  0x23   : > { %p3172_p9 = por %p492_p7, %p119_p1  ;;  %s107_s18 = ssub.s32 %s2987_s3, %s3715_s29 }
  0x24   : > { %s109_s19 = sor.u32 %s108_s0, %s107_s18  ;;  %p3178_p12 = por %p498_p10, %p125_p5 }
  0x25   : > { %p110_p11 = scmp.eq.s32.totalorder %s109_s19, 0  ;;  %p2792_p13 = scmp.lt.s32.totalorder %s2991_s26, 4 }
  0x26   : > { %s3680_s1 = scalar_select %p3178_p12, 1, 0 }
  0x27   : > { %s610_s27 = sand.u32 1, %s2971_s23   ;;  %s2547_s14 = sshll.u32 %s2983_s25, 4 }
  0x28   : > { %3681 = sst [smem:[#allocation13_spill]] %s3680_s1  ;;  %s2464_s17 = sshll.u32 %s610_s27, 7 }
  0x29   : > { %s3185_s16 = scalar_select %p110_p11, %s2971_s23, %s112_s30  }
  0x2a   : > { %s2467_s15 = sshll.u32 %s2987_s3, 5  ;;  %s614_s12 = scalar_lea.vmem [#allocation2], %s2464_s17 }
  0x2b   : > { %3682 = sst [smem:[#allocation14_spill]] %s3185_s16  ;;  %s624_s11 = sshll.u32 %s614_s12, 4  ;;  %s625_s11 = int_to_ptr.vmem [resolvable:$true] %s624_s11 }
  0x2c   : > { %s621_s13 = sadd.s32 %s2547_s14, %s2467_s15  ;;  %p3191_p0 = pnand %p2792_p13, %p3160_p3 }
  0x2d   : > { %s2468_s29 = sshll.u32 %s621_s13, 7  ;;  %s3684_s0 = sld [smem:[#allocation17_spill]] }
  0x2e   : > { %s611_s30 = scalar_lea.sflag [#allocation3], %s610_s27  ;;  %p2869_p1 = pneg %p3191_p0 }
  0x2f   : > { %s2880_s25 = scalar_lea.vmem %s625_s11, 2048  ;;  %s2993_s12 = smov [#allocation2]  }
  0x30   : > { %p2881_p2 = scmp.ne.s32.totalorder %s625_s11, %s2880_s25  ;;  %s2885_s14 = sshll.u32 %s2993_s12, 4  ;;  %s2886_s14 = int_to_ptr.vmem [resolvable:$false] %s2885_s14 }
  0x31   : > { %s2887_s13 = scalar_lea.vmem %s2886_s14, 4096  ;;  %p2888_p3 = scmp.lt.s32.totalorder %s625_s11, %s2886_s14 }
  0x32   : > { %p2883_p4 = pnand %p2881_p2, %p2869_p1  ;;  %p2889_p6 = scmp.lt.s32.totalorder %s2887_s13, %s2880_s25 }
  0x33   : > { %s623_s1 = scalar_lea.hbm %s3684_s0, %s2468_s29 }
  0x34   : > { %p2884_p5 = pneg %p2883_p4  ;;  %p2890_p7 = por %p2889_p6, %p2888_p3 }
  0x36   : > { %p2891_p10 = pnand %p2890_p7, %p2884_p5 }
  0x38   : > { %2894 = shalt.err (!%p2891_p10)
}
  0x39   : > { %s2994_s15 = smov 128   ;;  %s2995_s17 = smov 8  }
  0x3a   : > { %2787 = dma.hbm_to_vmem [thread:$0]  (!%p3191_p0), %s623_s1, 2048, %s625_s11, %s611_s30, %s2994_s15, %s2994_s15, %s2995_s17  }
  0x3b   : > { %p2469_p11 = scmp.ge.s32.totalorder %s2991_s26, 1  ;;  %p638_p13 = scmp.lt.s32.totalorder %s2991_s26, 5 }
  0x3d   : > { %p639_p1 = pnand %p2469_p11, %p638_p13 }
  0x3e   : > { %s3205_s29 = sand.u32 (!%p639_p1), 1, %s2967_s22  }
  0x3f   : > { %642 = sbr.rel (%p639_p1) target bundleno = 1331 (0x533), region = 96  ;;  %s3655_s25 = sshll.u32 (!%p639_p1), %s3205_s29, 7 }
  0x40   : > { %s645_s21 = scalar_lea.sflag (!%p639_p1), [#allocation3], %s3205_s29  ;;  %s3211_s27 = scalar_lea.vmem (!%p639_p1), [#allocation2], %s3655_s25 }
  0x44   : > { %2954 = dma.done.wait (%p3168_p8), %s645_s21, 2048  }
  0x45   : > { %2956 = vsyncadd (%p3168_p8), %s645_s21, 4294965248  ;;  %p729_p0 = scmp.lt.s32.totalorder %s2979_s2, 1  ;;  %p736_p2 = scmp.lt.s32.totalorder %s2975_s24, 1  ;;  %v2996_v0 = vmov 0.0   ;;  %vm2997_vm0 = vmmov 0   ;;  %vm776_vm1 = vcmask 64512   ;;  %v1140_v28 = vlaneseq }
  0x46   : > { %2633 = vmatprep.subr.mxu0 %v2996_v0  ;;  %2635 = vmatprep.mubr.msk.f32.mxu0 %vm2997_vm0, %v2996_v0  ;;  %s3685_s30 = sld [smem:[#allocation15_spill]]  ;;  %v850_v2 = vld [vmem:[%s3630_s5] sm:$0xff]  ;;  %v940_v5 = vld [vmem:[%s3631_s6 + $0x8] sm:$0xff]  ;;  %vm941_vm2 = vcmask 130048   ;;  %v760_v10 = vld [vmem:[%s3211_s27 + $0x10] sm:$0xff]  ;;  %vm1521_vm3 = vcmask 122880  }
  0x47   : > { %s3223_s11 = scalar_select %p729_p0, %s2979_s2, 1  ;;  %v758_v7 = vld [vmem:[%s3211_s27] sm:$0xff]  ;;  %v759_v9 = vld [vmem:[%s3211_s27 + $0x8] sm:$0xff]  ;;  %v761_v11 = vld [vmem:[%s3211_s27 + $0x18] sm:$0xff]  ;;  %v1141_v29 = vshrl.u32 %v1140_v28, 7  ;;  %vm1284_vm4 = vcmask 261120  }
  0x48   : > { %s737_s1 = scalar_select %p736_p2, %s2975_s24, 1  ;;  %v939_v8 = vld [vmem:[%s3631_s6] sm:$0xff]  ;;  %v763_v13 = vld [vmem:[%s3211_s27 + $0x28] sm:$0xff]  ;;  %v764_v14 = vld [vmem:[%s3211_s27 + $0x30] sm:$0xff]  ;;  %v2998_v34 = vmov 1966171168  }
  0x49   : > { %s2474_s20 = sshll.u32 %s3223_s11, 1  ;;  %s2548_s18 = sshll.u32 %s3223_s11, 4  ;;  %v762_v12 = vld [vmem:[%s3211_s27 + $0x20] sm:$0xff]  ;;  %v765_v15 = vld [vmem:[%s3211_s27 + $0x38] sm:$0xff]  ;;  %v767_v17 = vld [vmem:[%s3211_s27 + $0x48] sm:$0xff]  ;;  %v3304_v30 = vsub.s32 0, %v1141_v29  ;;  %v1138_v35 = vunpack.c.l.s4 %v2998_v34 }
  0x4a   : > { %s3228_s19 = sadd.s32 %s2474_s20, %s737_s1  ;;  %s3686_s17 = sld [smem:[#allocation19_spill]]  ;;  %v766_v16 = vld [vmem:[%s3211_s27 + $0x40] sm:$0xff]  ;;  %v768_v18 = vld [vmem:[%s3211_s27 + $0x50] sm:$0xff]  ;;  %v769_v19 = vld [vmem:[%s3211_s27 + $0x58] sm:$0xff]  ;;  %vm1629_vm5 = vcmask 1041409   ;;  %vm1631_vm6 = vcmask 1042434  }
  0x4b   : > { %s2475_s14 = sshll.u32 %s3228_s19, 3  ;;  %s3687_s3 = sld [smem:[#allocation16_spill]]  ;;  %v770_v20 = vld [vmem:[%s3211_s27 + $0x60] sm:$0xff]  ;;  %v771_v21 = vld [vmem:[%s3211_s27 + $0x68] sm:$0xff]  ;;  %v772_v22 = vld [vmem:[%s3211_s27 + $0x70] sm:$0xff]  ;;  %v1139_v36 = vunpack.c.0.s8 %v1138_v35  ;;  %vm1633_vm7 = vcmask 1043459  }
  0x4c   : > { %s733_s12 = scalar_lea.vmem %s3685_s30, %s2548_s18  ;;  %v773_v23 = vld [vmem:[%s3211_s27 + $0x78] sm:$0xff]  ;;  %v1275_v25 = vld [vmem:[%s3633_s8 + $0x10] sm:$0xff]  ;;  %v1274_v26 = vld [vmem:[%s3633_s8 + $0x8] sm:$0xff]  ;;  %s3688_s20 = sld [smem:[#allocation18_spill]]  ;;  %vm1635_vm8 = vcmask 1044484   ;;  %vm1637_vm9 = vcmask 1045509  }
  0x4d   : > { %v755_v3 = vld [vmem:[%s733_s12] sm:$0xff]  ;;  %v756_v6 = vld [vmem:[%s733_s12 + $0x8] sm:$0xff]  ;;  %v1276_v24 = vld [vmem:[%s3633_s8 + $0x18] sm:$0xff]  ;;  %v1142_v37 = vsub.s32 %v1139_v36, %v1141_v29  ;;  %vm1639_vm10 = vcmask 1046534   ;;  %vm1641_vm11 = vcmask 1047559   ;;  %s3691_s25 = sshll.u32 %s3205_s29, 7 }
  0x4e   : > { %2671 = vmatprep.subr.mxu1 %v1276_v24  ;;  %v1273_v27 = vld [vmem:[%s3633_s8] sm:$0xff]  ;;  %s3469_s0 = scalar_lea.vmem [#allocation5], %s3691_s25  ;;  %s3692_s13 = sld [smem:[#allocation21_spill]] }
  0x4f   : > { %2672 = vmatpush3.msra.mxu1 %v1276_v24  ;;  %v2479_v45 = vld [vmem:[%s3632_s7] ss:$0 sm:$0xff]  ;;  %s3694_s30 = sld [smem:[#allocation23_spill]]  ;;  %s2543_s12 = sshll.u32 %s2979_s2, 5 }
  0x50   : > { %v775_v1 = vld [vmem:[%s3686_s17] sm:$0xff]  ;;  %2673 = vmatprep.subr.mxu1 %v1275_v25  ;;  %s3693_s17 = sld [smem:[#allocation24_spill]]  ;;  %s2292_s21 = sshll.u32 %s3469_s0, 4  ;;  %s3563_s21 = int_to_ptr.vmem [resolvable:$true] %s2292_s21 }
  0x51   : > { %s741_s16 = scalar_lea.vmem %s3687_s3, %s2475_s14  ;;  %2634 = vmatpush3.msra.mxu0 %v775_v1  ;;  %2674 = vmatpush3.msra.mxu1 %v1275_v25  ;;  %s3690_s3 = sld [smem:[#allocation20_spill]] }
  0x52   : > { %v3245_v4 = vld [vmem:[%s741_s16] sm:$0xff]  ;;  %2638 = vmatprep.subr.mxu0 %v850_v2  ;;  %2675 = vmatprep.subr.mxu1 %v1274_v26  ;;  %s745_s18 = scalar_lea.vmem %s3688_s20, %s3223_s11  ;;  %s3689_s20 = sld [smem:[#allocation22_spill]] }
  0x53   : > { %2636 = vmatmul.mubr.msk.f32.vlgmr.msra.gmra.mxu0 %vm776_vm1, %v3245_v4  ;;  %2676 = vmatpush3.msra.mxu1 %v1274_v26  ;;  %v774_v31 = vld [vmem:[%s745_s18] sm:$0x1]  ;;  %s3695_s27 = sld [smem:[#allocation26_spill]]  ;;  %s2268_s16 = scalar_lea.sflag [#allocation4], %s3205_s29 }
  0x54   : > { %2639 = vmatpush3.msra.mxu0 %v850_v2  ;;  %2640 = vmatprep.mubr.msk.f32.mxu0 %vm776_vm1, %v755_v3  ;;  %v1522_v32 = vsel %vm1521_vm3, %v774_v31, 0.0  ;;  %v1497_v33 = vrot.slane %v774_v31, %v3304_v30  ;;  %s3696_s25 = sld [smem:[#allocation25_spill]] }
  0x55   : > { %2643 = vmatprep.subr.mxu0 %v940_v5  ;;  %2677 = vmatprep.subr.mxu1 %v1273_v27  ;;  %s3697_s11 = sld [smem:[#allocation28_spill]] }
  0x56   : > { %2678 = vmatpush3.msra.mxu1 %v1273_v27  ;;  %1523 = vadd.xlane.f32.xlu0 %v1522_v32 }
  0x57   : > { %2641 = vmatmul.mubr.msk.f32.vlgmr.msra.gmra.mxu0 %vm776_vm1, %v756_v6  ;;  %1503 = vbcast.lane.b32.xlu1 %v1497_v33, 264 }
  0x58   : > { %2644 = vmatpush3.msra.mxu0 %v940_v5  ;;  %2647 = vmatprep.mubr.msk.f32.mxu0 %vm941_vm2, %v758_v7 }
  0x59   : > { %2645 = vmatprep.subr.mxu0 %v939_v8 }
  0x5a   : > { %2646 = vmatpush3.msra.mxu0 %v939_v8 }
  0x5b   : > { %2648 = vmatmul.mubr.msk.f32.vlgmr.msra.gmra.mxu0 %vm941_vm2, %v759_v9  ;;  %2703 = vmatprep.subr.mxu0 %v2996_v0 }
  0x5c   : > { %2650 = vmatprep.mubr.msk.f32.mxu0 %vm941_vm2, %v760_v10 }
  0x5f   : > { %2651 = vmatmul.mubr.msk.f32.gmra.mxu0 %vm941_vm2, %v761_v11 }
  0x60   : > { %2653 = vmatprep.mubr.msk.f32.mxu0 %vm941_vm2, %v762_v12 }
  0x63   : > { %2654 = vmatmul.mubr.msk.f32.gmra.mxu0 %vm941_vm2, %v763_v13 }
  0x64   : > { %2656 = vmatprep.mubr.msk.f32.mxu0 %vm941_vm2, %v764_v14 }
  0x67   : > { %2657 = vmatmul.mubr.msk.f32.gmra.mxu0 %vm941_vm2, %v765_v15 }
  0x68   : > { %2659 = vmatprep.mubr.msk.f32.mxu0 %vm941_vm2, %v766_v16 }
  0x6b   : > { %2660 = vmatmul.mubr.msk.f32.gmra.mxu0 %vm941_vm2, %v767_v17 }
  0x6c   : > { %2662 = vmatprep.mubr.msk.f32.mxu0 %vm941_vm2, %v768_v18  ;;  %1499 = vbcast.lane.b32.xlu0 %v1497_v33, 256 }
  0x6f   : > { %2663 = vmatmul.mubr.msk.f32.gmra.mxu0 %vm941_vm2, %v769_v19 }
  0x70   : > { %2665 = vmatprep.mubr.msk.f32.mxu0 %vm941_vm2, %v770_v20 }
  0x73   : > { %2666 = vmatmul.mubr.msk.f32.gmra.mxu0 %vm941_vm2, %v771_v21 }
  0x74   : > { %2668 = vmatprep.mubr.msk.f32.mxu0 %vm941_vm2, %v772_v22 }
  0x77   : > { %2669 = vmatmul.mubr.msk.f32.gmra.mxu0 %vm941_vm2, %v773_v23 }
  0x78   : > { %2711 = vmatprep.mubr.msk.f32.mxu0 %vm2997_vm0, %v2996_v0 }
 0x113   : > { %v846_v38 = vpop.f32.mrf.mxu0 }
 0x114   : > { %v1143_v39 = vrot.slane %v846_v38, %v1142_v37  ;;  %v1136_v50 = vcombine.high %v846_v38, %v846_v38 }
 0x115   : > { %v2637_v40 = vpop.f32.mrf.mxu0 }
 0x116   : > { %v1151_v41 = vcombine.high %v1143_v39, %v1143_v39  ;;  %v1159_v42 = vrot.slane %v1143_v39, %v1142_v37  ;;  %v1150_v61 = vrot.slane %v1136_v50, %v1142_v37 }
 0x117   : > { %v2642_v43 = vpop.f32.mrf.mxu0 }
 0x118   : > { %v1188_v46 = vrot.slane %v1159_v42, %v3304_v30  ;;  %v1173_v47 = vrot.slane %v1151_v41, %v1142_v37  ;;  %v3315_v51 = vadd.f32 %v2642_v43, %v2479_v45  ;;  %v1181_v56 = vcombine.high %v1159_v42, %v1159_v42 }
 0x119   : > { %v930_v44 = vpop.f32.mrf.mxu0  ;;  %v1152_v10 = vcombine.high %v1150_v61, %v1150_v61  ;;  %v1166_v15 = vrot.slane %v1150_v61, %v1142_v37 }
 0x11a   : > { %v3317_v53 = vadd.f32 %v2479_v45, %v930_v44  ;;  %v1192_v55 = vrot.slane %v1173_v47, %v3304_v30  ;;  %v1196_v1 = vrot.slane %v1181_v56, %v3304_v30  ;;  %v1183_v3 = vcombine.high %v1173_v47, %v1173_v47 }
 0x11b   : > { %v2649_v48 = vpop.f32.mrf.mxu0  ;;  %v1204_v24 = vrot.slane %v1166_v15, %v3304_v30  ;;  %v1180_v25 = vrot.slane %v1152_v10, %v1142_v37  ;;  %v1182_v36 = vcombine.high %v1166_v15, %v1166_v15  ;;  %v1610_v10 = vld [vmem:[%s3635_s10] sm:$0xff] }
 0x11c   : > { %v1226_v49 = vadd.f32 %v2649_v48, %v1188_v46  ;;  %v1200_v14 = vrot.slane %v1183_v3, %v3304_v30 }
 0x11d   : > { %v1056_v52 = vpop.f32.mrf.mxu0  ;;  %v1208_v35 = vrot.slane %v1180_v25, %v3304_v30  ;;  %v1212_v45 = vrot.slane %v1182_v36, %v3304_v30 }
 0x11e   : > { %v1225_v54 = vadd.f32 %v1188_v46, %v1056_v52  ;;  %v1242_v57 = vadd.f32 %v1226_v49, %v3315_v51  ;;  %v1184_v46 = vcombine.high %v1180_v25, %v1180_v25 }
 0x11f   : > { %v2652_v58 = vpop.f32.mrf.mxu0 }
 0x120   : > { %v1228_v59 = vadd.f32 %v2652_v58, %v1192_v55  ;;  %v1241_v60 = vadd.f32 %v1225_v54, %v3317_v53  ;;  %v1258_v5 = vmax.f32 %v1242_v57, 0.0  ;;  %v1216_v57 = vrot.slane %v1184_v46, %v3304_v30 }
 0x121   : > { %v1066_v62 = vpop.f32.mrf.mxu0 }
 0x122   : > { %v1227_v63 = vadd.f32 %v1192_v55, %v1066_v62  ;;  %v1257_v2 = vmax.f32 %v1241_v60, 0.0  ;;  %v1244_v6 = vadd.f32 %v1228_v59, %v3315_v51 }
 0x123   : > { %v2655_v7 = vpop.f32.mrf.mxu0 }
 0x124   : > { %v1243_v8 = vadd.f32 %v1227_v63, %v3317_v53  ;;  %v1230_v9 = vadd.f32 %v2655_v7, %v1196_v1  ;;  %2679 = vmatprep.mubr.msk.f32.mxu1 %vm1284_vm4, %v1257_v2  ;;  %v1260_v16 = vmax.f32 %v1244_v6, 0.0 }
 0x125   : > { %v1076_v11 = vpop.f32.mrf.mxu0  ;;  %2680 = vmatmul.mubr.msk.f32.vlgmr.msra.gmra.mxu1 %vm1284_vm4, %v1258_v5 }
 0x126   : > { %v1259_v12 = vmax.f32 %v1243_v8, 0.0  ;;  %v1229_v13 = vadd.f32 %v1196_v1, %v1076_v11  ;;  %v1246_v17 = vadd.f32 %v1230_v9, %v3315_v51  ;;  %v1613_v9 = vld [vmem:[%s3635_s10 + $0x18] sm:$0xff]  ;;  %v3377_v11 = vld [vmem:[%s3634_s9] ss:$0 sm:$0xff] }
 0x127   : > { %v2658_v18 = vpop.f32.mrf.mxu0  ;;  %2714 = vmatprep.subr.mxu1 %v1613_v9  ;;  %2704 = vmatpush3.msra.mxu0 %v1613_v9 }
 0x128   : > { %v1245_v19 = vadd.f32 %v1229_v13, %v3317_v53  ;;  %v1232_v20 = vadd.f32 %v2658_v18, %v1200_v14  ;;  %2682 = vmatprep.mubr.msk.f32.mxu1 %vm1284_vm4, %v1259_v12  ;;  %v1262_v26 = vmax.f32 %v1246_v17, 0.0  ;;  %2715 = vmatpush3.msra.mxu1 %v1613_v9  ;;  %v3379_v12 = vpop.xlane.xlu0 %1523 }
 0x129   : > { %v1086_v21 = vpop.f32.mrf.mxu0  ;;  %2683 = vmatmul.mubr.msk.f32.gmra.mxu1 %vm1284_vm4, %v1260_v16  ;;  %2705 = vmatprep.subr.mxu0 %v2996_v0 }
 0x12a   : > { %v1261_v22 = vmax.f32 %v1245_v19, 0.0  ;;  %v1231_v23 = vadd.f32 %v1200_v14, %v1086_v21  ;;  %v1248_v27 = vadd.f32 %v1232_v20, %v3315_v51  ;;  %v3385_v21 = vpop.permute.xlu1 %1503 }
 0x12b   : > { %v2661_v28 = vpop.f32.mrf.mxu0 }
 0x12c   : > { %v1247_v29 = vadd.f32 %v1231_v23, %v3317_v53  ;;  %v1234_v31 = vadd.f32 %v2661_v28, %v1204_v24  ;;  %2685 = vmatprep.mubr.msk.f32.mxu1 %vm1284_vm4, %v1261_v22  ;;  %v1264_v38 = vmax.f32 %v1248_v27, 0.0  ;;  %v3383_v19 = vpop.permute.xlu0 %1499 }
 0x12d   : > { %v1096_v32 = vpop.f32.mrf.mxu0  ;;  %2686 = vmatmul.mubr.msk.f32.gmra.mxu1 %vm1284_vm4, %v1262_v26 }
 0x12e   : > { %v1263_v33 = vmax.f32 %v1247_v29, 0.0  ;;  %v1233_v34 = vadd.f32 %v1204_v24, %v1096_v32  ;;  %v1250_v37 = vadd.f32 %v1234_v31, %v3315_v51 }
 0x12f   : > { %v2664_v39 = vpop.f32.mrf.mxu0 }
 0x130   : > { %v1249_v40 = vadd.f32 %v1233_v34, %v3317_v53  ;;  %v1236_v41 = vadd.f32 %v2664_v39, %v1208_v35  ;;  %2688 = vmatprep.mubr.msk.f32.mxu1 %vm1284_vm4, %v1263_v33  ;;  %v1266_v47 = vmax.f32 %v1250_v37, 0.0 }
 0x131   : > { %v1106_v42 = vpop.f32.mrf.mxu0  ;;  %2689 = vmatmul.mubr.msk.f32.gmra.mxu1 %vm1284_vm4, %v1264_v38 }
 0x132   : > { %v1265_v43 = vmax.f32 %v1249_v40, 0.0  ;;  %v1235_v44 = vadd.f32 %v1208_v35, %v1106_v42  ;;  %v1252_v48 = vadd.f32 %v1236_v41, %v3315_v51 }
 0x133   : > { %v2667_v49 = vpop.f32.mrf.mxu0 }
 0x134   : > { %v1251_v50 = vadd.f32 %v1235_v44, %v3317_v53  ;;  %v1238_v52 = vadd.f32 %v2667_v49, %v1212_v45  ;;  %2691 = vmatprep.mubr.msk.f32.mxu1 %vm1284_vm4, %v1265_v43  ;;  %v1268_v58 = vmax.f32 %v1252_v48, 0.0 }
 0x135   : > { %v1116_v54 = vpop.f32.mrf.mxu0  ;;  %2692 = vmatmul.mubr.msk.f32.gmra.mxu1 %vm1284_vm4, %v1266_v47 }
 0x136   : > { %v1267_v55 = vmax.f32 %v1251_v50, 0.0  ;;  %v1237_v56 = vadd.f32 %v1212_v45, %v1116_v54  ;;  %v1254_v59 = vadd.f32 %v1238_v52, %v3315_v51 }
 0x137   : > { %v2670_v60 = vpop.f32.mrf.mxu0 }
 0x138   : > { %v1253_v61 = vadd.f32 %v1237_v56, %v3317_v53  ;;  %v1240_v62 = vadd.f32 %v2670_v60, %v1216_v57  ;;  %2694 = vmatprep.mubr.msk.f32.mxu1 %vm1284_vm4, %v1267_v55  ;;  %v1270_v3 = vmax.f32 %v1254_v59, 0.0 }
 0x139   : > { %v1126_v63 = vpop.f32.mrf.mxu0  ;;  %2695 = vmatmul.mubr.msk.f32.gmra.mxu1 %vm1284_vm4, %v1268_v58 }
 0x13a   : > { %v1269_v1 = vmax.f32 %v1253_v61, 0.0  ;;  %v1239_v2 = vadd.f32 %v1216_v57, %v1126_v63  ;;  %v1256_v5 = vadd.f32 %v1240_v62, %v3315_v51  ;;  %v1612_v51 = vld [vmem:[%s3635_s10 + $0x10] sm:$0xff] }
 0x13b   : > { %2716 = vmatprep.subr.mxu1 %v1612_v51  ;;  %2706 = vmatpush3.msra.mxu0 %v1612_v51 }
 0x13c   : > { %v1255_v6 = vadd.f32 %v1239_v2, %v3317_v53  ;;  %2697 = vmatprep.mubr.msk.f32.mxu1 %vm1284_vm4, %v1269_v1  ;;  %v1272_v8 = vmax.f32 %v1256_v5, 0.0  ;;  %2717 = vmatpush3.msra.mxu1 %v1612_v51  ;;  %v1611_v53 = vld [vmem:[%s3635_s10 + $0x8] sm:$0xff] }
 0x13d   : > { %2698 = vmatmul.mubr.msk.f32.gmra.mxu1 %vm1284_vm4, %v1270_v3  ;;  %2707 = vmatprep.subr.mxu0 %v2996_v0 }
 0x13e   : > { %v1271_v7 = vmax.f32 %v1255_v6, 0.0  ;;  %2718 = vmatprep.subr.mxu1 %v1611_v53  ;;  %2708 = vmatpush3.msra.mxu0 %v1611_v53 }
 0x13f   : > { %2719 = vmatpush3.msra.mxu1 %v1611_v53  ;;  %2709 = vmatprep.subr.mxu0 %v2996_v0 }
 0x140   : > { %2700 = vmatprep.mubr.msk.f32.mxu1 %vm1284_vm4, %v1271_v7  ;;  %2720 = vmatprep.subr.mxu1 %v1610_v10 }
 0x141   : > { %2701 = vmatmul.mubr.msk.f32.gmra.mxu1 %vm1284_vm4, %v1272_v8  ;;  %2710 = vmatpush3.msra.mxu0 %v1610_v10 }
 0x142   : > { %2721 = vmatpush3.msra.mxu1 %v1610_v10  ;;  %2746 = vmatprep.subr.mxu0 %v2996_v0 }
 0x1e5   : > { %v2681_v13 = vpop.f32.mrf.mxu1 }
 0x1e6   : > { %v1405_v14 = vadd.f32 %v2681_v13, %v3377_v11 }
 0x1e7   : > { %v1399_v15 = vpop.f32.mrf.mxu1 }
 0x1e8   : > { %v1400_v16 = vadd.f32 %v3377_v11, %v1399_v15  ;;  %v1479_v17 = vmax.f32 %v1405_v14, 0.0 }
 0x1e9   : > { %v2684_v18 = vpop.f32.mrf.mxu1 }
 0x1ea   : > { %v1478_v20 = vmax.f32 %v1400_v16, 0.0  ;;  %v1415_v22 = vadd.f32 %v2684_v18, %v3377_v11  ;;  %v1506_v28 = vmul.f32 %v3385_v21, %v1479_v17 }
 0x1eb   : > { %v1409_v23 = vpop.f32.mrf.mxu1 }
 0x1ec   : > { %v1410_v24 = vadd.f32 %v3377_v11, %v1409_v23  ;;  %v1505_v25 = vmul.f32 %v3383_v19, %v1478_v20  ;;  %v1481_v26 = vmax.f32 %v1415_v22, 0.0  ;;  %v1526_v57 = vsel %vm1284_vm4, %v1506_v28, 0.0 }
 0x1ed   : > { %v2687_v27 = vpop.f32.mrf.mxu1 }
 0x1ee   : > { %v1480_v29 = vmax.f32 %v1410_v24, 0.0  ;;  %v1425_v31 = vadd.f32 %v2687_v27, %v3377_v11  ;;  %2722 = vmatprep.mubr.msk.f32.mxu1 %vm1284_vm4, %v1505_v25  ;;  %v1508_v36 = vmul.f32 %v3385_v21, %v1481_v26  ;;  %v1525_v47 = vsel %vm1284_vm4, %v1505_v25, 0.0 }
 0x1ef   : > { %v1419_v32 = vpop.f32.mrf.mxu1  ;;  %2723 = vmatmul.mubr.msk.f32.vlgmr.msra.gmra.mxu1 %vm1284_vm4, %v1506_v28  ;;  %v1527_v63 = vadd.f32 %v1526_v57, %v1525_v47 }
 0x1f0   : > { %v1507_v33 = vmul.f32 %v3383_v19, %v1480_v29  ;;  %v1483_v34 = vmax.f32 %v1425_v31, 0.0  ;;  %v1420_v35 = vadd.f32 %v3377_v11, %v1419_v32  ;;  %v1535_v46 = vsel %vm1284_vm4, %v1508_v36, 0.0 }
 0x1f1   : > { %v2690_v38 = vpop.f32.mrf.mxu1  ;;  %v1528_v15 = vrot.slane %v1527_v63, 4 }
 0x1f2   : > { %v1482_v37 = vmax.f32 %v1420_v35, 0.0  ;;  %v1435_v39 = vadd.f32 %v2690_v38, %v3377_v11  ;;  %2725 = vmatprep.mubr.msk.f32.mxu1 %vm1284_vm4, %v1507_v33  ;;  %v1510_v40 = vmul.f32 %v3385_v21, %v1483_v34  ;;  %v1534_v42 = vsel %vm1284_vm4, %v1507_v33, 0.0 }
 0x1f3   : > { %v1429_v41 = vpop.f32.mrf.mxu1  ;;  %2726 = vmatmul.mubr.msk.f32.gmra.mxu1 %vm1284_vm4, %v1508_v36  ;;  %v1536_v55 = vadd.f32 %v1535_v46, %v1534_v42  ;;  %v1600_v33 = vrot.slane %v3379_v12, %v3304_v30  ;;  %v1529_v34 = vadd.f32 %v1528_v15, %v1527_v63 }
 0x1f4   : > { %v1509_v43 = vmul.f32 %v3383_v19, %v1482_v37  ;;  %v1485_v44 = vmax.f32 %v1435_v39, 0.0  ;;  %v1430_v45 = vadd.f32 %v3377_v11, %v1429_v41  ;;  %v1544_v56 = vsel %vm1284_vm4, %v1510_v40, 0.0 }
 0x1f5   : > { %v2693_v48 = vpop.f32.mrf.mxu1  ;;  %v1537_v8 = vrot.slane %v1536_v55, 4  ;;  %2865 = vrcp.f32 %v1600_v33 }
 0x1f6   : > { %v1543_v49 = vsel %vm1284_vm4, %v1509_v43, 0.0  ;;  %v1512_v50 = vmul.f32 %v3385_v21, %v1485_v44  ;;  %v1484_v52 = vmax.f32 %v1430_v45, 0.0  ;;  %v1445_v54 = vadd.f32 %v2693_v48, %v3377_v11  ;;  %2728 = vmatprep.mubr.msk.f32.mxu1 %vm1284_vm4, %v1509_v43 }
 0x1f7   : > { %v1439_v58 = vpop.f32.mrf.mxu1  ;;  %2729 = vmatmul.mubr.msk.f32.gmra.mxu1 %vm1284_vm4, %v1510_v40  ;;  %v1545_v59 = vadd.f32 %v1544_v56, %v1543_v49  ;;  %v1538_v24 = vadd.f32 %v1537_v8, %v1536_v55  ;;  %v1530_v48 = vrot.slane %v1529_v34, 2 }
 0x1f8   : > { %v1511_v60 = vmul.f32 %v3383_v19, %v1484_v52  ;;  %v1487_v61 = vmax.f32 %v1445_v54, 0.0  ;;  %v1440_v62 = vadd.f32 %v3377_v11, %v1439_v58  ;;  %v1553_v1 = vsel %vm1284_vm4, %v1512_v50, 0.0 }
 0x1f9   : > { %v2696_v2 = vpop.f32.mrf.mxu1  ;;  %v1546_v53 = vrot.slane %v1545_v59, 4  ;;  %v1539_v42 = vrot.slane %v1538_v24, 2  ;;  %v1531_v63 = vadd.f32 %v1530_v48, %v1529_v34 }
 0x1fa   : > { %v1552_v3 = vsel %vm1284_vm4, %v1511_v60, 0.0  ;;  %v1514_v5 = vmul.f32 %v3385_v21, %v1487_v61  ;;  %v1486_v6 = vmax.f32 %v1440_v62, 0.0  ;;  %v1455_v7 = vadd.f32 %v2696_v2, %v3377_v11  ;;  %2731 = vmatprep.mubr.msk.f32.mxu1 %vm1284_vm4, %v1511_v60 }
 0x1fb   : > { %v1554_v9 = vadd.f32 %v1553_v1, %v1552_v3  ;;  %v1449_v51 = vpop.f32.mrf.mxu1  ;;  %2732 = vmatmul.mubr.msk.f32.gmra.mxu1 %vm1284_vm4, %v1512_v50  ;;  %v1547_v28 = vadd.f32 %v1546_v53, %v1545_v59  ;;  %v1540_v57 = vadd.f32 %v1539_v42, %v1538_v24 }
 0x1fc   : > { %v1513_v10 = vmul.f32 %v3383_v19, %v1486_v6  ;;  %v1489_v13 = vmax.f32 %v1455_v7, 0.0  ;;  %v1450_v14 = vadd.f32 %v3377_v11, %v1449_v51  ;;  %v1562_v18 = vsel %vm1284_vm4, %v1514_v5, 0.0 }
 0x1fd   : > { %v1555_v16 = vrot.slane %v1554_v9, 4  ;;  %v2699_v17 = vpop.f32.mrf.mxu1  ;;  %v1548_v30 = vrot.slane %v1547_v28, 2  ;;  %v1541_v6 = vrot.slane %v1540_v57, 1 }
 0x1fe   : > { %v1561_v20 = vsel %vm1284_vm4, %v1513_v10, 0.0  ;;  %v1488_v22 = vmax.f32 %v1450_v14, 0.0  ;;  %v1465_v23 = vadd.f32 %v2699_v17, %v3377_v11  ;;  %2734 = vmatprep.mubr.msk.f32.mxu1 %vm1284_vm4, %v1513_v10  ;;  %v1516_v26 = vmul.f32 %v3385_v21, %v1489_v13 }
 0x1ff   : > { %v1563_v25 = vadd.f32 %v1562_v18, %v1561_v20  ;;  %v1459_v27 = vpop.f32.mrf.mxu1  ;;  %2735 = vmatmul.mubr.msk.f32.gmra.mxu1 %vm1284_vm4, %v1514_v5  ;;  %v1556_v35 = vadd.f32 %v1555_v16, %v1554_v9  ;;  %v1549_v59 = vadd.f32 %v1548_v30, %v1547_v28  ;;  %v1532_v10 = vrot.slane %v1531_v63, 1 }
 0x200   : > { %v1515_v29 = vmul.f32 %v3383_v19, %v1488_v22  ;;  %v1491_v31 = vmax.f32 %v1465_v23, 0.0  ;;  %v1460_v32 = vadd.f32 %v3377_v11, %v1459_v27  ;;  %v1571_v44 = vsel %vm1284_vm4, %v1516_v26, 0.0 }
 0x201   : > { %v1564_v36 = vrot.slane %v1563_v25, 4  ;;  %v2702_v38 = vpop.f32.mrf.mxu1  ;;  %v1557_v49 = vrot.slane %v1556_v35, 2  ;;  %v1550_v8 = vrot.slane %v1549_v59, 1  ;;  %v1542_v17 = vadd.f32 %v1541_v6, %v1540_v57 }
 0x202   : > { %v1570_v37 = vsel %vm1284_vm4, %v1515_v29, 0.0  ;;  %v1518_v39 = vmul.f32 %v3385_v21, %v1491_v31  ;;  %v1490_v40 = vmax.f32 %v1460_v32, 0.0  ;;  %v1475_v41 = vadd.f32 %v2702_v38, %v3377_v11  ;;  %2737 = vmatprep.mubr.msk.f32.mxu1 %vm1284_vm4, %v1515_v29  ;;  %v2866_v28 = vpop.eup %2865 }
 0x203   : > { %v1565_v43 = vadd.f32 %v1564_v36, %v1563_v25  ;;  %v1469_v45 = vpop.f32.mrf.mxu1  ;;  %2738 = vmatmul.mubr.msk.f32.gmra.mxu1 %vm1284_vm4, %v1516_v26  ;;  %v1572_v12 = vadd.f32 %v1571_v44, %v1570_v37  ;;  %v1558_v1 = vadd.f32 %v1557_v49, %v1556_v35  ;;  %v1551_v23 = vadd.f32 %v1550_v8, %v1549_v59 }
 0x204   : > { %v1517_v46 = vmul.f32 %v3383_v19, %v1490_v40  ;;  %v1493_v47 = vmax.f32 %v1475_v41, 0.0  ;;  %v1470_v50 = vadd.f32 %v3377_v11, %v1469_v45  ;;  %v1580_v55 = vsel %vm1284_vm4, %v1518_v39, 0.0 }
 0x205   : > { %v1566_v52 = vrot.slane %v1565_v43, 2  ;;  %v1573_v54 = vrot.slane %v1572_v12, 4  ;;  %v1559_v13 = vrot.slane %v1558_v1, 1  ;;  %v1533_v24 = vadd.f32 %v1532_v10, %v1531_v63 }
 0x206   : > { %v1579_v56 = vsel %vm1284_vm4, %v1517_v46, 0.0  ;;  %2740 = vmatprep.mubr.msk.f32.mxu1 %vm1284_vm4, %v1517_v46  ;;  %v1520_v61 = vmul.f32 %v3385_v21, %v1493_v47  ;;  %v1492_v62 = vmax.f32 %v1470_v50, 0.0  ;;  %v1603_v31 = vmul.f32 %v2866_v28, %v1542_v17  ;;  %v1944_v50 = vld [vmem:[%s3689_s20 + $0x8] sm:$0xff] }
 0x207   : > { %v1581_v58 = vadd.f32 %v1580_v55, %v1579_v56  ;;  %2741 = vmatmul.mubr.msk.f32.gmra.mxu1 %vm1284_vm4, %v1518_v39  ;;  %v1574_v60 = vadd.f32 %v1573_v54, %v1572_v12  ;;  %v1567_v2 = vadd.f32 %v1566_v52, %v1565_v43  ;;  %v1560_v25 = vadd.f32 %v1559_v13, %v1558_v1  ;;  %v1943_v52 = vld [vmem:[%s3689_s20] sm:$0xff] }
 0x208   : > { %v1519_v5 = vmul.f32 %v3383_v19, %v1492_v62  ;;  %v1589_v51 = vsel %vm1284_vm4, %v1520_v61, 0.0  ;;  %v1604_v34 = vmul.f32 %v2866_v28, %v1551_v23  ;;  %v1602_v36 = vmul.f32 %v2866_v28, %v1533_v24  ;;  %v2515_v54 = vld [vmem:[%s3690_s3] ss:$0 sm:$0xff]  ;;  %s2895_s3 = scalar_lea.vmem %s3563_s21, 2048 }
 0x209   : > { %v1582_v11 = vrot.slane %v1581_v58, 4  ;;  %v1575_v3 = vrot.slane %v1574_v60, 2  ;;  %v1568_v16 = vrot.slane %v1567_v2, 1  ;;  %v1605_v38 = vmul.f32 %v2866_v28, %v1560_v25  ;;  %p2896_p8 = scmp.ne.s32.totalorder %s3563_s21, %s2895_s3 }
 0x20a   : > { %v1588_v53 = vsel %vm1284_vm4, %v1519_v5, 0.0  ;;  %2743 = vmatprep.mubr.msk.f32.mxu1 %vm1284_vm4, %v1519_v5  ;;  %v1630_v40 = vsel %vm1629_vm5, %v1603_v31, %v1602_v36  ;;  %v1909_v55 = vmul.f32 %v2515_v54, %v3385_v21  ;;  %v2100_v31 = vld [vmem:[%s3693_s17 + $0x18] sm:$0xff] }
 0x20b   : > { %v1583_v7 = vadd.f32 %v1582_v11, %v1581_v58  ;;  %v1576_v9 = vadd.f32 %v1575_v3, %v1574_v60  ;;  %v1590_v15 = vadd.f32 %v1589_v51, %v1588_v53  ;;  %2744 = vmatmul.mubr.msk.f32.gmra.mxu1 %vm1284_vm4, %v1520_v61  ;;  %v1569_v29 = vadd.f32 %v1568_v16, %v1567_v2  ;;  %p2897_p4 = pnand %p2896_p8, %p3172_p9 }
 0x20c   : > { %v1632_v43 = vsel %vm1631_vm6, %v1604_v34, %v1630_v40  ;;  %v1908_v58 = vmul.f32 %v2515_v54, %v3383_v19 }
 0x20d   : > { %v1584_v14 = vrot.slane %v1583_v7, 2  ;;  %v1577_v18 = vrot.slane %v1576_v9, 1  ;;  %v1591_v22 = vrot.slane %v1590_v15, 4  ;;  %v1606_v39 = vmul.f32 %v2866_v28, %v1569_v29  ;;  %p2898_p5 = pneg %p2897_p4 }
 0x20e   : > { %v1634_v30 = vsel %vm1633_vm7, %v1605_v38, %v1632_v43  ;;  %v2535_v38 = vld [vmem:[%s3694_s30] ss:$0 sm:$0xff]  ;;  %v2184_v43 = vld [vmem:[%s3695_s27 + $0x10] sm:$0xff]  ;;  %s2549_s30 = sshll.u32 %s2975_s24, 4  ;;  %s2999_s24 = smov [#allocation5]  }
 0x20f   : > { %v1585_v20 = vadd.f32 %v1584_v14, %v1583_v7  ;;  %v1592_v27 = vadd.f32 %v1591_v22, %v1590_v15  ;;  %v1578_v32 = vadd.f32 %v1577_v18, %v1576_v9  ;;  %v1636_v12 = vsel %vm1635_vm8, %v1606_v39, %v1634_v30  ;;  %v2536_v30 = vld [vmem:[%s3696_s25] ss:$0 sm:$0xff]  ;;  %s2899_s2 = sshll.u32 %s2999_s24, 4  ;;  %s2900_s2 = int_to_ptr.vmem [resolvable:$false] %s2899_s2 }
 0x210   : > { %p2902_p3 = scmp.lt.s32.totalorder %s3563_s21, %s2900_s2 }
 0x211   : > { %v1586_v26 = vrot.slane %v1585_v20, 1  ;;  %v1593_v33 = vrot.slane %v1592_v27, 2  ;;  %v1607_v41 = vmul.f32 %v2866_v28, %v1578_v32  ;;  %v2099_v32 = vld [vmem:[%s3693_s17 + $0x10] sm:$0xff] }
 0x213   : > { %v1587_v35 = vadd.f32 %v1586_v26, %v1585_v20  ;;  %v1594_v37 = vadd.f32 %v1593_v33, %v1592_v27  ;;  %v1638_v47 = vsel %vm1637_vm9, %v1607_v41, %v1636_v12  ;;  %v2097_v33 = vld [vmem:[%s3693_s17] sm:$0xff] }
 0x215   : > { %v1595_v42 = vrot.slane %v1594_v37, 1  ;;  %v1608_v44 = vmul.f32 %v2866_v28, %v1587_v35 }
 0x217   : > { %v1596_v45 = vadd.f32 %v1595_v42, %v1594_v37  ;;  %v1640_v48 = vsel %vm1639_vm10, %v1608_v44, %v1638_v47  ;;  %v2185_v42 = vld [vmem:[%s3695_s27 + $0x18] sm:$0xff]  ;;  %v2183_v44 = vld [vmem:[%s3695_s27 + $0x8] sm:$0xff] }
 0x219   : > { %v1609_v46 = vmul.f32 %v2866_v28, %v1596_v45  ;;  %v1942_v28 = vld [vmem:[%s3692_s13] sm:$0xff]  ;;  %s2289_s13 = sadd.s32 %s2549_s30, %s2543_s12 }
 0x21a   : > { %v2182_v45 = vld [vmem:[%s3695_s27] sm:$0xff]  ;;  %s2544_s15 = sshll.u32 %s2289_s13, 7 }
 0x21b   : > { %v1642_v49 = vsel %vm1641_vm11, %v1609_v46, %v1640_v48  ;;  %s3561_s28 = scalar_lea.hbm %s3697_s11, %s2544_s15 }
 0x21c   : > { %2712 = vmatmul.mubr.msk.f32.vlgmr.msra.gmra.mxu0 %vm1284_vm4, %v1642_v49 }
 0x21d   : > { %2750 = vmatprep.mubr.msk.f32.mxu0 %vm2997_vm0, %v2996_v0  ;;  %2747 = vmatpush3.msra.mxu0 %v1944_v50 }
 0x21e   : > { %2748 = vmatprep.subr.mxu0 %v2996_v0 }
 0x21f   : > { %2749 = vmatpush3.msra.mxu0 %v1943_v52 }
 0x220   : > { %2753 = vmatprep.subr.mxu0 %v2996_v0 }
 0x2af   : > { %v2724_v56 = vpop.f32.mrf.mxu1 }
 0x2b0   : > { %v1911_v57 = vadd.f32 %v2724_v56, %v1909_v55 }
 0x2b1   : > { %v1829_v59 = vpop.f32.mrf.mxu1 }
 0x2b2   : > { %1927 = vst.msk [vmem:[%s3469_s0 + $0x8] sm:$0xff] %vm941_vm2, %v1911_v57  ;;  %v1910_v60 = vadd.f32 %v1908_v58, %v1829_v59 }
 0x2b3   : > { %v2727_v61 = vpop.f32.mrf.mxu1 }
 0x2b4   : > { %1926 = vst.msk [vmem:[%s3469_s0] sm:$0xff] %vm941_vm2, %v1910_v60  ;;  %v1913_v21 = vadd.f32 %v2727_v61, %v1909_v55 }
 0x2b5   : > { %v1839_v62 = vpop.f32.mrf.mxu1 }
 0x2b6   : > { %1929 = vst.msk [vmem:[%s3469_s0 + $0x18] sm:$0xff] %vm941_vm2, %v1913_v21  ;;  %v1912_v19 = vadd.f32 %v1908_v58, %v1839_v62 }
 0x2b7   : > { %v2730_v63 = vpop.f32.mrf.mxu1 }
 0x2b8   : > { %1928 = vst.msk [vmem:[%s3469_s0 + $0x10] sm:$0xff] %vm941_vm2, %v1912_v19  ;;  %v1915_v1 = vadd.f32 %v2730_v63, %v1909_v55 }
 0x2b9   : > { %v1849_v11 = vpop.f32.mrf.mxu1 }
 0x2ba   : > { %1931 = vst.msk [vmem:[%s3469_s0 + $0x28] sm:$0xff] %vm941_vm2, %v1915_v1  ;;  %v1914_v2 = vadd.f32 %v1908_v58, %v1849_v11 }
 0x2bb   : > { %v2733_v3 = vpop.f32.mrf.mxu1 }
 0x2bc   : > { %1930 = vst.msk [vmem:[%s3469_s0 + $0x20] sm:$0xff] %vm941_vm2, %v1914_v2  ;;  %v1917_v5 = vadd.f32 %v2733_v3, %v1909_v55 }
 0x2bd   : > { %v1859_v6 = vpop.f32.mrf.mxu1 }
 0x2be   : > { %1933 = vst.msk [vmem:[%s3469_s0 + $0x38] sm:$0xff] %vm941_vm2, %v1917_v5  ;;  %v1916_v7 = vadd.f32 %v1908_v58, %v1859_v6 }
 0x2bf   : > { %v2736_v8 = vpop.f32.mrf.mxu1 }
 0x2c0   : > { %1932 = vst.msk [vmem:[%s3469_s0 + $0x30] sm:$0xff] %vm941_vm2, %v1916_v7  ;;  %v1919_v9 = vadd.f32 %v2736_v8, %v1909_v55 }
 0x2c1   : > { %v1869_v51 = vpop.f32.mrf.mxu1 }
 0x2c2   : > { %1935 = vst.msk [vmem:[%s3469_s0 + $0x48] sm:$0xff] %vm941_vm2, %v1919_v9  ;;  %v1918_v53 = vadd.f32 %v1908_v58, %v1869_v51 }
 0x2c3   : > { %v2739_v10 = vpop.f32.mrf.mxu1 }
 0x2c4   : > { %1934 = vst.msk [vmem:[%s3469_s0 + $0x40] sm:$0xff] %vm941_vm2, %v1918_v53  ;;  %v1921_v13 = vadd.f32 %v2739_v10, %v1909_v55 }
 0x2c5   : > { %v1879_v14 = vpop.f32.mrf.mxu1 }
 0x2c6   : > { %1937 = vst.msk [vmem:[%s3469_s0 + $0x58] sm:$0xff] %vm941_vm2, %v1921_v13  ;;  %v1920_v15 = vadd.f32 %v1908_v58, %v1879_v14 }
 0x2c7   : > { %v2742_v16 = vpop.f32.mrf.mxu1 }
 0x2c8   : > { %1936 = vst.msk [vmem:[%s3469_s0 + $0x50] sm:$0xff] %vm941_vm2, %v1920_v15  ;;  %v1923_v17 = vadd.f32 %v2742_v16, %v1909_v55 }
 0x2c9   : > { %v1889_v18 = vpop.f32.mrf.mxu1 }
 0x2ca   : > { %1939 = vst.msk [vmem:[%s3469_s0 + $0x68] sm:$0xff] %vm941_vm2, %v1923_v17  ;;  %v1922_v20 = vadd.f32 %v1908_v58, %v1889_v18 }
 0x2cb   : > { %v2745_v22 = vpop.f32.mrf.mxu1 }
 0x2cc   : > { %1938 = vst.msk [vmem:[%s3469_s0 + $0x60] sm:$0xff] %vm941_vm2, %v1922_v20  ;;  %v1925_v23 = vadd.f32 %v2745_v22, %v1909_v55 }
 0x2cd   : > { %v1899_v24 = vpop.f32.mrf.mxu1 }
 0x2ce   : > { %1941 = vst.msk [vmem:[%s3469_s0 + $0x78] sm:$0xff] %vm941_vm2, %v1925_v23  ;;  %v1924_v25 = vadd.f32 %v1908_v58, %v1899_v24 }
 0x2d0   : > { %1940 = vst.msk [vmem:[%s3469_s0 + $0x70] sm:$0xff] %vm941_vm2, %v1924_v25  ;;  %s2901_s0 = scalar_lea.vmem %s2900_s2, 4096 }
 0x2d1   : > { %p2903_p6 = scmp.lt.s32.totalorder %s2901_s0, %s2895_s3 }
 0x2d3   : > { %p2904_p7 = por %p2903_p6, %p2902_p3 }
 0x2d5   : > { %p2905_p10 = pnand %p2904_p7, %p2898_p5 }
 0x2dc   : > { %v1711_v26 = vpop.f32.mrf.mxu0 }
 0x2dd   : > { %v1712_v27 = vadd.f32 %v2515_v54, %v1711_v26 }
 0x2de   : > { %v2713_v29 = vpop.f32.mrf.mxu0 }
 0x2df   : > { %2751 = vmatmul.mubr.msk.f32.vlgmr.msra.gmra.mxu0 %vm941_vm2, %v1712_v27 }
 0x2e0   : > { %2754 = vmatpush3.msra.mxu0 %v1942_v28  ;;  %2755 = vmatprep.mubr.msk.f32.mxu0 %vm2997_vm0, %v2996_v0 }
 0x2e1   : > { %2758 = vmatprep.subr.mxu0 %v2996_v0 }
 0x2e3   : > { %2756 = vmatmul.mubr.msk.f32.vlgmr.msra.gmra.mxu0 %vm776_vm1, %v3245_v4  ;;  %v2098_v4 = vld [vmem:[%s3693_s17 + $0x8] sm:$0xff] }
 0x2e4   : > { %2766 = vmatprep.mubr.msk.f32.mxu0 %vm2997_vm0, %v2996_v0  ;;  %2759 = vmatpush3.msra.mxu0 %v2100_v31 }
 0x2e5   : > { %2760 = vmatprep.subr.mxu0 %v2996_v0 }
 0x2e6   : > { %2761 = vmatpush3.msra.mxu0 %v2099_v32 }
 0x2e7   : > { %2762 = vmatprep.subr.mxu0 %v2996_v0 }
 0x2e8   : > { %2763 = vmatpush3.msra.mxu0 %v2098_v4 }
 0x2e9   : > { %2764 = vmatprep.subr.mxu0 %v2996_v0 }
 0x2ea   : > { %2765 = vmatpush3.msra.mxu0 %v2097_v33 }
 0x2eb   : > { %2769 = vmatprep.subr.mxu0 %v2996_v0 }
 0x39f   : > { %v2014_v34 = vpop.f32.mrf.mxu0 }
 0x3a1   : > { %v2752_v35 = vpop.f32.mrf.mxu0 }
 0x3a3   : > { %v2084_v36 = vpop.f32.mrf.mxu0 }
 0x3a4   : > { %v2085_v37 = vadd.f32 %v2084_v36, %v2014_v34 }
 0x3a5   : > { %v2757_v39 = vpop.f32.mrf.mxu0 }
 0x3a6   : > { %v2095_v40 = vadd.f32 %v2535_v38, %v2085_v37 }
 0x3a8   : > { %v2096_v41 = vmax.f32 %v2095_v40, 0.0 }
 0x3aa   : > { %2767 = vmatmul.mubr.msk.f32.vlgmr.msra.gmra.mxu0 %vm1284_vm4, %v2096_v41 }
 0x3ab   : > { %2770 = vmatpush3.msra.mxu0 %v2185_v42  ;;  %2777 = vmatprep.mubr.msk.f32.mxu0 %vm2997_vm0, %v2996_v0 }
 0x3ac   : > { %2771 = vmatprep.subr.mxu0 %v2996_v0 }
 0x3ad   : > { %2772 = vmatpush3.msra.mxu0 %v2184_v43 }
 0x3ae   : > { %2773 = vmatprep.subr.mxu0 %v2996_v0 }
 0x3af   : > { %2774 = vmatpush3.msra.mxu0 %v2183_v44 }
 0x3b0   : > { %2775 = vmatprep.subr.mxu0 %v2996_v0 }
 0x3b1   : > { %2776 = vmatpush3.msra.mxu0 %v2182_v45 }
 0x46a   : > { %v2177_v12 = vpop.f32.mrf.mxu0 }
 0x46b   : > { %v2178_v46 = vadd.f32 %v2536_v30, %v2177_v12 }
 0x46c   : > { %v2768_v47 = vpop.f32.mrf.mxu0 }
 0x46d   : > { %v2181_v48 = vmax.f32 %v2178_v46, 0.0 }
 0x46f   : > { %2778 = vmatmul.mubr.msk.f32.vlgmr.msra.gmra.mxu0 %vm1284_vm4, %v2181_v48 }
 0x470   : > { %2908 = shalt.err (!%p2905_p10)
}
 0x471   : > { %s2909_s25 = scalar_lea.hbm %s3561_s28, 2048  ;;  %s2913_s13 = scalar_lea.hbm %s3697_s11, 8192 }
 0x472   : > { %p2910_p11 = scmp.ne.s32.totalorder %s3561_s28, %s2909_s25  ;;  %p2914_p0 = scmp.lt.s32.totalorder %s3561_s28, %s3697_s11 }
 0x473   : > { %p2915_p2 = scmp.lt.s32.totalorder %s2913_s13, %s2909_s25 }
 0x474   : > { %p2911_p13 = pnand %p2910_p11, %p3172_p9 }
 0x475   : > { %p2916_p8 = por %p2915_p2, %p2914_p0 }
 0x476   : > { %p2912_p1 = pneg %p2911_p13 }
 0x478   : > { %p2917_p4 = pnand %p2916_p8, %p2912_p1 }
 0x47a   : > { %2920 = shalt.err (!%p2917_p4)
}
 0x47b   : > { %s3000_s18 = smov 128   ;;  %s3001_s3 = smov 8  }
 0x47c   : > { %2782 = dma.vmem_to_hbm [thread:$0]  (%p3172_p9), %s3563_s21, 2048, %s3561_s28, %s2268_s16, %s3000_s18, %s3000_s18, %s3001_s3  }
 0x47d   : > { %s3698_s0 = sld [smem:[#allocation27_spill]] }
 0x47e   : > { %s3699_s12 = sld [smem:[#allocation29_spill]] }
 0x483   : > { %v2538_v0 = vld [vmem:[%s3698_s0] ss:$0 sm:$0xff] }
 0x484   : > { %s754_s13 = scalar_lea.vmem %s3699_s12, %s2475_s14 }
 0x52f   : > { %v2262_v49 = vpop.f32.mrf.mxu0 }
 0x530   : > { %v2263_v50 = vadd.f32 %v2538_v0, %v2262_v49 }
 0x531   : > { %v2779_v52 = vpop.f32.mrf.mxu0 }
 0x532   : > { %2266 = vst.msk [vmem:[%s754_s13] sm:$0xff] %vm776_vm1, %v2263_v50 }
 0x533 PF: > { %s3700_s15 = sld [smem:[#allocation8_spill]]  ;;  %p2793_p5 = scmp.ge.s32.totalorder %s2991_s26, 2 }
 0x535   : > { %p2789_p9 = pnand %p2793_p5, %p3178_p12 }
 0x537   : > { %p2790_p3 = pneg %p2789_p9 }
 0x539   : > { %s2310_s29 = sand.u32 1, %s3700_s15  }
 0x53a   : > { %s2311_s21 = scalar_lea.sflag [#allocation4], %s2310_s29 }
 0x53b   : > { %2958 = dma.done.wait (%p2790_p3), %s2311_s21, 2048  }
 0x53c   : > { %2960 = vsyncadd (%p2790_p3), %s2311_s21, 4294965248  ;;  %s37_s26 = sadd.s32 1, %s2991_s26   ;;  %s3702_s19 = sld [smem:[#allocation14_spill]] }
 0x53d   : > { %p34_p6 = scmp.ge.s32.totalorder %s37_s26, 6   ;;  %s3703_s24 = sld [smem:[#allocation9_spill]] }
 0x53e   : > { %s3704_s2 = sld [smem:[#allocation10_spill]]  ;;  %s3707_s1 = smov %s2967_s22 }
 0x53f   : > { %s3705_s25 = sld [smem:[#allocation11_spill]]  ;;  %s3708_s22 = smov %s2971_s23 }
 0x540   : > { %s3706_s3 = sld [smem:[#allocation12_spill]]  ;;  %36 = sbr.rel (!%p34_p6) target bundleno = 23 (0x17), region = 162 }
 0x542   : > { %s3709_s23 = smov %s3702_s19 }
 0x545   :  { %2327 = vsyncpa [#allocation3], 1 }
 0x546   :  { %2329 = vsyncpa [#allocation3 + $0x1], 1 }
 0x547   :  { %2330 = vsyncpa [#allocation4], 1 }
 0x548   :  { %2332 = vsyncpa [#allocation4 + $0x1], 1 }

</bundles_post_ra>
